<compile_context>
chip_gen: v7x
topology: tpu7x:2x2x1
jax: 0.10.0
libtpu: 0.0.40
codegen_flags: <defaults>
</compile_context>

<pallas_src>
import math
from functools import partial

import jax
import jax.numpy as jnp
from jax.experimental import pallas as pl
from jax.experimental.pallas import tpu as pltpu

LANE = 128
ACT_DTYPE = jnp.bfloat16   # bf16 operands for MXU; accumulation stays f32.


def _round_up(x, m):
    return (x + m - 1) // m * m


# ----------------------------------------------------------------------------
# In-kernel helpers
# ----------------------------------------------------------------------------
def _masked_ln_relu(x, gamma, beta, d_true):
    """LayerNorm over the first `d_true` lanes (eps=1e-5, biased var) + ReLU.

    Requires lanes >= d_true of `x` to be zero (maintained by zero-padded
    weights/biases everywhere).  gamma/beta are zero-padded, so padded lanes
    come out exactly 0 again.
    """
    lane = jax.lax.broadcasted_iota(jnp.int32, x.shape, 1)
    mask = lane < d_true
    mean = jnp.sum(x, axis=-1, keepdims=True) / d_true        # pad lanes are 0
    diff = x - mean
    var = jnp.sum(jnp.where(mask, diff, 0.0) ** 2, axis=-1, keepdims=True) / d_true
    xn = diff * jax.lax.rsqrt(var + 1e-5)
    y = xn * gamma + beta
    return jnp.maximum(y, 0.0)


# ----------------------------------------------------------------------------
# Pallas kernels
# ----------------------------------------------------------------------------
def _mm_bias_kernel(x_ref, w_ref, b_ref, o_ref):
    # (TM, K) @ (K, N) + (1, N)
    x = x_ref[...]
    acc = jnp.dot(x, w_ref[...], preferred_element_type=jnp.float32)
    o_ref[...] = (acc + b_ref[...]).astype(o_ref.dtype)


def _ln_mm_ln_kernel(x_ref, g1_ref, b1_ref, w_ref, b_ref, g2_ref, b2_ref, o_ref,
                     *, d_in, d_mid):
    # LN(d_in)+ReLU -> @W+b -> LN(d_mid)+ReLU   (ByteNet block "sequence1")
    x = x_ref[...].astype(jnp.float32)
    h = _masked_ln_relu(x, g1_ref[...], b1_ref[...], d_in)
    h = jnp.dot(h.astype(w_ref.dtype), w_ref[...],
                preferred_element_type=jnp.float32) + b_ref[...]
    h = _masked_ln_relu(h, g2_ref[...], b2_ref[...], d_mid)
    o_ref[...] = h.astype(o_ref.dtype)


def _ln_mm_res_kernel(x_ref, g1_ref, b1_ref, w_ref, b_ref, r_ref, o_ref, *, d_in):
    # LN(d_in)+ReLU -> @W+b -> + residual        (ByteNet block "sequence2" + skip)
    x = x_ref[...].astype(jnp.float32)
    h = _masked_ln_relu(x, g1_ref[...], b1_ref[...], d_in)
    h = jnp.dot(h.astype(w_ref.dtype), w_ref[...],
                preferred_element_type=jnp.float32) + b_ref[...]
    o_ref[...] = (h + r_ref[...].astype(jnp.float32)).astype(o_ref.dtype)


def _dilated_conv_kernel(x_ref, w_ref, b_ref, o_ref, *, L, k, dilation, pad):
    # x: (1, L, Dp), w: (k*Dp, Dp), b: (1, Dp) -> o: (1, L, Dp)
    # Same-padding dilated conv as ONE matmul: concatenate the k shifted views
    # along lanes -> (L, k*Dp) operand, single MXU issue (K = k*128).
    Dp = x_ref.shape[-1]
    x = x_ref[0].astype(jnp.float32)                       # (L, Dp)
    if pad > 0:
        z = jnp.zeros((pad, Dp), jnp.float32)
        xp = jnp.concatenate([z, x, z], axis=0)            # in-kernel halo pad
    else:
        xp = x
    taps = [xp[j * dilation: j * dilation + L, :] for j in range(k)]
    op = jnp.concatenate(taps, axis=-1)                    # (L, k*Dp)
    acc = jnp.dot(op.astype(w_ref.dtype), w_ref[...],
                  preferred_element_type=jnp.float32)
    o_ref[0] = (acc + b_ref[...]).astype(o_ref.dtype)


# ----------------------------------------------------------------------------
# pallas_call wrappers (row tiling over M = N*L, weights resident)
# ----------------------------------------------------------------------------
_TM = 256  # rows per block; small enough for v5e's 16 MiB scoped VMEM.


def matmul_bias(x, w, b):
    M, K = x.shape
    N = w.shape[1]
    tm = min(_TM, M)
    return pl.pallas_call(
        _mm_bias_kernel,
        out_shape=jax.ShapeDtypeStruct((M, N), x.dtype),
        grid=(pl.cdiv(M, tm),),
        in_specs=[
            pl.BlockSpec((tm, K), lambda i: (i, 0)),
            pl.BlockSpec((K, N), lambda i: (0, 0)),
            pl.BlockSpec((1, N), lambda i: (0, 0)),
        ],
        out_specs=pl.BlockSpec((tm, N), lambda i: (i, 0)),
        compiler_params=pltpu.CompilerParams(dimension_semantics=("parallel",)),
        cost_estimate=pl.CostEstimate(
            flops=2 * M * K * N, transcendentals=0,
            bytes_accessed=(M * K + M * N) * x.dtype.itemsize + K * N * w.dtype.itemsize),
    )(x, w, b.reshape(1, N))


def ln_relu_matmul_ln_relu(x, g1, b1, w, b, g2, b2, *, d_in, d_mid):
    M, K = x.shape
    N = w.shape[1]
    tm = min(_TM, M)
    kern = partial(_ln_mm_ln_kernel, d_in=d_in, d_mid=d_mid)
    return pl.pallas_call(
        kern,
        out_shape=jax.ShapeDtypeStruct((M, N), x.dtype),
        grid=(pl.cdiv(M, tm),),
        in_specs=[
            pl.BlockSpec((tm, K), lambda i: (i, 0)),
            pl.BlockSpec((1, K), lambda i: (0, 0)),
            pl.BlockSpec((1, K), lambda i: (0, 0)),
            pl.BlockSpec((K, N), lambda i: (0, 0)),
            pl.BlockSpec((1, N), lambda i: (0, 0)),
            pl.BlockSpec((1, N), lambda i: (0, 0)),
            pl.BlockSpec((1, N), lambda i: (0, 0)),
        ],
        out_specs=pl.BlockSpec((tm, N), lambda i: (i, 0)),
        compiler_params=pltpu.CompilerParams(dimension_semantics=("parallel",)),
        cost_estimate=pl.CostEstimate(
            flops=2 * M * K * N, transcendentals=M,
            bytes_accessed=(M * K + M * N) * x.dtype.itemsize + K * N * w.dtype.itemsize),
    )(x, g1.reshape(1, K), b1.reshape(1, K), w, b.reshape(1, N),
      g2.reshape(1, N), b2.reshape(1, N))


def ln_relu_matmul_residual(x, g1, b1, w, b, residual, *, d_in):
    M, K = x.shape
    N = w.shape[1]
    tm = min(_TM, M)
    kern = partial(_ln_mm_res_kernel, d_in=d_in)
    return pl.pallas_call(
        kern,
        out_shape=jax.ShapeDtypeStruct((M, N), x.dtype),
        grid=(pl.cdiv(M, tm),),
        in_specs=[
            pl.BlockSpec((tm, K), lambda i: (i, 0)),
            pl.BlockSpec((1, K), lambda i: (0, 0)),
            pl.BlockSpec((1, K), lambda i: (0, 0)),
            pl.BlockSpec((K, N), lambda i: (0, 0)),
            pl.BlockSpec((1, N), lambda i: (0, 0)),
            pl.BlockSpec((tm, N), lambda i: (i, 0)),
        ],
        out_specs=pl.BlockSpec((tm, N), lambda i: (i, 0)),
        compiler_params=pltpu.CompilerParams(dimension_semantics=("parallel",)),
        cost_estimate=pl.CostEstimate(
            flops=2 * M * K * N, transcendentals=M,
            bytes_accessed=(M * K + 2 * M * N) * x.dtype.itemsize + K * N * w.dtype.itemsize),
    )(x, g1.reshape(1, K), b1.reshape(1, K), w, b.reshape(1, N), residual)


def dilated_conv1d(x, w_flat, b, dilation, k):
    """x: (N, L, Dp) channels-last.  w_flat: (k*Dp, Dp) (tap-major rows).
    Matches PyTorch MaskedConv1d with padding = dilation*(k-1)//2."""
    N, L, Dp = x.shape
    KDp, Dout = w_flat.shape
    pad = dilation * (k - 1) // 2
    kern = partial(_dilated_conv_kernel, L=L, k=k, dilation=dilation, pad=pad)
    # TODO(synk): for large L, tile the L axis with an explicit halo instead of
    # whole-sequence blocks (fine at the small L used here).
    return pl.pallas_call(
        kern,
        out_shape=jax.ShapeDtypeStruct((N, L, Dout), x.dtype),
        grid=(N,),
        in_specs=[
            pl.BlockSpec((1, L, Dp), lambda n: (n, 0, 0)),
            pl.BlockSpec((KDp, Dout), lambda n: (0, 0)),
            pl.BlockSpec((1, Dout), lambda n: (0, 0)),
        ],
        out_specs=pl.BlockSpec((1, L, Dout), lambda n: (n, 0, 0)),
        compiler_params=pltpu.CompilerParams(dimension_semantics=("parallel",)),
        cost_estimate=pl.CostEstimate(
            flops=2 * N * L * KDp * Dout, transcendentals=0,
            bytes_accessed=(N * L * Dp + N * L * Dout) * x.dtype.itemsize
                           + KDp * Dout * w_flat.dtype.itemsize),
    )(x, w_flat, b.reshape(1, Dout))


# ----------------------------------------------------------------------------
# Model (parameter construction + forward pass)
# ----------------------------------------------------------------------------
def positional_encoding_1d(d_model, length):
    assert d_model % 2 == 0
    pos = jnp.arange(length, dtype=jnp.float32)[:, None]
    div = jnp.exp(
        jnp.arange(0, d_model, 2, dtype=jnp.float32) * (-(math.log(10000.0) / d_model)))
    pe = jnp.zeros((length, d_model), jnp.float32)
    pe = pe.at[:, 0::2].set(jnp.sin(pos * div))
    pe = pe.at[:, 1::2].set(jnp.cos(pos * div))
    return pe


def init_params(key, *, n_tokens, d_embedding, d_model, n_layers, kernel_size, r,
                slim=True, dtype=ACT_DTYPE):
    log2 = int(math.log2(r)) + 1
    dilations = [2 ** (n % log2) for n in range(n_layers)]
    d_h = d_model // 2 if slim else d_model

    d_emb_p = _round_up(d_embedding, LANE)
    d_model_p = _round_up(d_model, LANE)
    d_h_p = _round_up(d_h, LANE)
    n_tok_p = _round_up(n_tokens, LANE)

    n_keys = 5 + 12 * n_layers + 2          # exact count + margin (previous bug)
    keys = iter(jax.random.split(key, n_keys))

    def nrm(shape, scale=0.1):
        return scale * jax.random.normal(next(keys), shape, dtype=jnp.float32)

    def pad2(a, r_p, c_p):
        return jnp.pad(a, ((0, r_p - a.shape[0]), (0, c_p - a.shape[1])))

    def pad1(a, c_p):
        return jnp.pad(a, ((0, c_p - a.shape[0]),))

    params = {
        "emb": pad2(nrm((n_tokens, d_embedding)), n_tokens, d_emb_p).astype(dtype),
        "w_up": pad2(nrm((d_embedding, d_model)), d_emb_p, d_model_p).astype(dtype),
        "b_up": pad1(nrm((d_model,)), d_model_p),
        "w_dec": pad2(nrm((d_model, n_tokens)), d_model_p, n_tok_p).astype(dtype),
        "b_dec": pad1(nrm((n_tokens,)), n_tok_p),
        "layers": [],
    }
    for _ in range(n_layers):
        wc = nrm((kernel_size, d_h, d_h))      # taps: (k, d_in, d_out)
        wc_p = jnp.pad(wc, ((0, 0), (0, d_h_p - d_h), (0, d_h_p - d_h)))
        lp = {
            "ln1_g": pad1(1.0 + nrm((d_model,)), d_model_p),
            "ln1_b": pad1(nrm((d_model,)), d_model_p),
            "w1": pad2(nrm((d_model, d_h)), d_model_p, d_h_p).astype(dtype),
            "b1": pad1(nrm((d_h,)), d_h_p),
            "ln2_g": pad1(1.0 + nrm((d_h,)), d_h_p),
            "ln2_b": pad1(nrm((d_h,)), d_h_p),
            "wc": wc_p.reshape(kernel_size * d_h_p, d_h_p).astype(dtype),
            "bc": pad1(nrm((d_h,)), d_h_p),
            "ln3_g": pad1(1.0 + nrm((d_h,)), d_h_p),
            "ln3_b": pad1(nrm((d_h,)), d_h_p),
            "w2": pad2(nrm((d_h, d_model)), d_h_p, d_model_p).astype(dtype),
            "b2": pad1(nrm((d_model,)), d_model_p),
        }
        params["layers"].append(lp)

    dims = dict(d_emb=d_embedding, d_emb_p=d_emb_p, d_model=d_model,
                d_model_p=d_model_p, d_h=d_h, d_h_p=d_h_p,
                n_tokens=n_tokens, n_tok_p=n_tok_p)
    return params, dilations, dims


def bytenet_block_forward(x, p, dims, dilation, kernel_size):
    # x: (N, L, d_model_p); returns x + seq2(conv(seq1(x)))  — 3 fused kernels.
    N, L, Dp = x.shape
    xf = x.reshape(N * L, Dp)
    h = ln_relu_matmul_ln_relu(xf, p["ln1_g"], p["ln1_b"], p["w1"], p["b1"],
                               p["ln2_g"], p["ln2_b"],
                               d_in=dims["d_model"], d_mid=dims["d_h"])
    h = dilated_conv1d(h.reshape(N, L, dims["d_h_p"]), p["wc"], p["bc"],
                       dilation, kernel_size)
    out = ln_relu_matmul_residual(h.reshape(N * L, dims["d_h_p"]),
                                  p["ln3_g"], p["ln3_b"], p["w2"], p["b2"], xf,
                                  d_in=dims["d_h"])
    return out.reshape(N, L, Dp)


def bytenet_lm_time_forward(params, dilations, dims, cfg, x_tokens, y):
    """x_tokens: (N, L) int32 tokens, y: (N,) int32 timesteps -> (N, L, n_tokens)."""
    N, L = x_tokens.shape
    d_emb_p = dims["d_emb_p"]
    # embedder (gather; glue)
    e = params["emb"][x_tokens]                                # (N, L, d_emb_p)
    # time encoding — mirrors the PyTorch expand(L, N, d).reshape(N, L, d) quirk exactly
    pe = positional_encoding_1d(cfg["d_embedding"], cfg["timesteps"])
    pe = jnp.pad(pe, ((0, 0), (0, d_emb_p - dims["d_emb"])))
    e2 = pe[y]                                                 # (N, d_emb_p)
    e2 = jnp.broadcast_to(e2[None, :, :], (L, N, d_emb_p)).reshape(N, L, d_emb_p)
    e = (e.astype(jnp.float32) + e2).astype(params["w_up"].dtype)
    # up_embedder: PositionFeedForward(d_embedding, d_model)
    h = matmul_bias(e.reshape(N * L, d_emb_p), params["w_up"], params["b_up"])
    h = h.reshape(N, L, dims["d_model_p"])
    # ByteNet blocks (dropout=0.0, causal=False, input_mask=None)
    for lp, dil in zip(params["layers"], dilations):
        h = bytenet_block_forward(h, lp, dims, dil, cfg["kernel_size"])
    # last_norm = Identity (final_ln=False); decoder PFF(d_model, n_tokens)
    out = matmul_bias(h.reshape(N * L, dims["d_model_p"]),
                      params["w_dec"], params["b_dec"])
    out = out.reshape(N, L, dims["n_tok_p"])[:, :, :dims["n_tokens"]]
    return out


# ----------------------------------------------------------------------------
if __name__ == "__main__":
    cfg = dict(
        n_tokens=20,
        d_embedding=8,
        d_model=32,
        n_layers=2,
        kernel_size=5,
        r=4,
        timesteps=100,
    )
    key = jax.random.PRNGKey(0)
    kp, kx, ky = jax.random.split(key, 3)
    params, dilations, dims = init_params(
        kp,
        n_tokens=cfg["n_tokens"],
        d_embedding=cfg["d_embedding"],
        d_model=cfg["d_model"],
        n_layers=cfg["n_layers"],
        kernel_size=cfg["kernel_size"],
        r=cfg["r"],
        slim=True,
    )

    N, L = 2, 8
    x_tokens = jax.random.randint(kx, (N, L), 0, cfg["n_tokens"], dtype=jnp.int32)
    y_times = jax.random.randint(ky, (N,), 0, cfg["timesteps"], dtype=jnp.int32)

    fwd = jax.jit(partial(bytenet_lm_time_forward, params, dilations, dims, cfg))
    out = jax.block_until_ready(fwd(x_tokens, y_times))
    assert out.shape == (N, L, cfg["n_tokens"]), out.shape
    assert jnp.all(jnp.isfinite(out.astype(jnp.float32)))
    print("KERNEL_OK")
</pallas_src>

<mosaic_0001>
module attributes {stable_mosaic.version = 11 : i64} {
  func.func @_mm_bias_kernel(%arg0: i32, %arg1: memref<16x128xbf16, #tpu.memory_space<vmem>>, %arg2: memref<128x128xbf16, #tpu.memory_space<vmem>>, %arg3: memref<1x128xf32, #tpu.memory_space<vmem>>, %arg4: memref<16x128xbf16, #tpu.memory_space<vmem>>) attributes {dimension_semantics = [#tpu.dimension_semantics<parallel>], iteration_bounds = array<i64: 1>, scalar_prefetch = 0 : i64, scratch_operands = 0 : i64, tpu.core_type = #tpu.core_type<tc>, window_params = [{transform_indices = @transform_0, window_bounds = array<i64: 16, 128>}, {pipeline_mode = #tpu.pipeline_mode<synchronous>, transform_indices = @transform_1, window_bounds = array<i64: 128, 128>}, {pipeline_mode = #tpu.pipeline_mode<synchronous>, transform_indices = @transform_2, window_bounds = array<i64: 1, 128>}, {transform_indices = @transform_3, window_bounds = array<i64: 16, 128>}]} {
    %c0 = arith.constant 0 : index
    %c0_0 = arith.constant 0 : index
    %0 = vector.load %arg1[%c0, %c0_0] : memref<16x128xbf16, #tpu.memory_space<vmem>>, vector<16x128xbf16>
    %c0_1 = arith.constant 0 : index
    %c0_2 = arith.constant 0 : index
    %1 = vector.load %arg2[%c0_1, %c0_2] : memref<128x128xbf16, #tpu.memory_space<vmem>>, vector<128x128xbf16>
    %cst = arith.constant dense<0.000000e+00> : vector<16x128xf32>
    %2 = tpu.matmul %0, %1, %cst {dimension_numbers = #tpu.dot_dimension_numbers<[1], [0], [0], [1], [0, 0, 1, 1], [], []>} : vector<16x128xbf16>, vector<128x128xbf16>, vector<16x128xf32> -> vector<16x128xf32>
    %c0_3 = arith.constant 0 : index
    %c0_4 = arith.constant 0 : index
    %3 = vector.load %arg3[%c0_3, %c0_4] : memref<1x128xf32, #tpu.memory_space<vmem>>, vector<1x128xf32>
    %4 = vector.broadcast %3 : vector<1x128xf32> to vector<16x128xf32>
    %5 = arith.addf %2, %4 : vector<16x128xf32>
    %6 = arith.truncf %5 : vector<16x128xf32> to vector<16x128xbf16>
    %c0_5 = arith.constant 0 : index
    %c0_6 = arith.constant 0 : index
    %7 = vector.load %arg4[%c0_5, %c0_6] : memref<16x128xbf16, #tpu.memory_space<vmem>>, vector<16x128xbf16>
    tpu.vector_store %arg4[%c0_5, %c0_6], %6 {strides = array<i32>} : memref<16x128xbf16, #tpu.memory_space<vmem>>, vector<16x128xbf16>,
    return
  }
  func.func @transform_0(%arg0: i32) -> (i32, i32) {
    %c0_i32 = arith.constant 0 : i32
    %c0_i32_0 = arith.constant 0 : i32
    return %arg0, %c0_i32 : i32, i32
  }
  func.func @transform_1(%arg0: i32) -> (i32, i32) {
    %c0_i32 = arith.constant 0 : i32
    %c0_i32_0 = arith.constant 0 : i32
    %c0_i32_1 = arith.constant 0 : i32
    return %c0_i32, %c0_i32_0 : i32, i32
  }
  func.func @transform_2(%arg0: i32) -> (i32, i32) {
    %c0_i32 = arith.constant 0 : i32
    %c0_i32_0 = arith.constant 0 : i32
    %c0_i32_1 = arith.constant 0 : i32
    return %c0_i32, %c0_i32_0 : i32, i32
  }
  func.func @transform_3(%arg0: i32) -> (i32, i32) {
    %c0_i32 = arith.constant 0 : i32
    %c0_i32_0 = arith.constant 0 : i32
    return %arg0, %c0_i32 : i32, i32
  }
}

module attributes {stable_mosaic.version = 11 : i64} {
  func.func @_ln_mm_ln_kernel(%arg0: i32, %arg1: memref<16x128xbf16, #tpu.memory_space<vmem>>, %arg2: memref<1x128xf32, #tpu.memory_space<vmem>>, %arg3: memref<1x128xf32, #tpu.memory_space<vmem>>, %arg4: memref<128x128xbf16, #tpu.memory_space<vmem>>, %arg5: memref<1x128xf32, #tpu.memory_space<vmem>>, %arg6: memref<1x128xf32, #tpu.memory_space<vmem>>, %arg7: memref<1x128xf32, #tpu.memory_space<vmem>>, %arg8: memref<16x128xbf16, #tpu.memory_space<vmem>>) attributes {dimension_semantics = [#tpu.dimension_semantics<parallel>], iteration_bounds = array<i64: 1>, scalar_prefetch = 0 : i64, scratch_operands = 0 : i64, tpu.core_type = #tpu.core_type<tc>, window_params = [{transform_indices = @transform_0, window_bounds = array<i64: 16, 128>}, {pipeline_mode = #tpu.pipeline_mode<synchronous>, transform_indices = @transform_1, window_bounds = array<i64: 1, 128>}, {pipeline_mode = #tpu.pipeline_mode<synchronous>, transform_indices = @transform_2, window_bounds = array<i64: 1, 128>}, {pipeline_mode = #tpu.pipeline_mode<synchronous>, transform_indices = @transform_3, window_bounds = array<i64: 128, 128>}, {pipeline_mode = #tpu.pipeline_mode<synchronous>, transform_indices = @transform_4, window_bounds = array<i64: 1, 128>}, {pipeline_mode = #tpu.pipeline_mode<synchronous>, transform_indices = @transform_5, window_bounds = array<i64: 1, 128>}, {pipeline_mode = #tpu.pipeline_mode<synchronous>, transform_indices = @transform_6, window_bounds = array<i64: 1, 128>}, {transform_indices = @transform_7, window_bounds = array<i64: 16, 128>}]} {
    %c0 = arith.constant 0 : index
    %c0_0 = arith.constant 0 : index
    %0 = vector.load %arg1[%c0, %c0_0] : memref<16x128xbf16, #tpu.memory_space<vmem>>, vector<16x128xbf16>
    %1 = arith.extf %0 : vector<16x128xbf16> to vector<16x128xf32>
    %c0_1 = arith.constant 0 : index
    %c0_2 = arith.constant 0 : index
    %2 = vector.load %arg2[%c0_1, %c0_2] : memref<1x128xf32, #tpu.memory_space<vmem>>, vector<1x128xf32>
    %c0_3 = arith.constant 0 : index
    %c0_4 = arith.constant 0 : index
    %3 = vector.load %arg3[%c0_3, %c0_4] : memref<1x128xf32, #tpu.memory_space<vmem>>, vector<1x128xf32>
    %4 = tpu.iota {dimensions = array<i32: 1>} : vector<16x128xi32>
    %c32_i32 = arith.constant 32 : i32
    %5 = vector.broadcast %c32_i32 : i32 to vector<16x128xi32>
    %6 = arith.cmpi slt, %4, %5 : vector<16x128xi32>
    %cst = arith.constant dense<0.000000e+00> : vector<16xf32>
    %7 = vector.multi_reduction <add>, %1, %cst [1] : vector<16x128xf32> to vector<16xf32>
    %8 = vector.shape_cast %7 : vector<16xf32> to vector<16x1xf32>
    %cst_5 = arith.constant 3.200000e+01 : f32
    %9 = vector.broadcast %cst_5 : f32 to vector<16x1xf32>
    %10 = arith.divf %8, %9 : vector<16x1xf32>
    %11 = vector.broadcast %10 : vector<16x1xf32> to vector<16x128xf32>
    %12 = arith.subf %1, %11 : vector<16x128xf32>
    %cst_6 = arith.constant 0.000000e+00 : f32
    %13 = vector.broadcast %cst_6 : f32 to vector<16x128xf32>
    %14 = arith.select %6, %12, %13 : vector<16x128xi1>, vector<16x128xf32>
    %15 = arith.mulf %14, %14 : vector<16x128xf32>
    %cst_7 = arith.constant dense<0.000000e+00> : vector<16xf32>
    %16 = vector.multi_reduction <add>, %15, %cst_7 [1] : vector<16x128xf32> to vector<16xf32>
    %17 = vector.shape_cast %16 : vector<16xf32> to vector<16x1xf32>
    %cst_8 = arith.constant 3.200000e+01 : f32
    %18 = vector.broadcast %cst_8 : f32 to vector<16x1xf32>
    %19 = arith.divf %17, %18 : vector<16x1xf32>
    %cst_9 = arith.constant 9.99999974E-6 : f32
    %20 = vector.broadcast %cst_9 : f32 to vector<16x1xf32>
    %21 = arith.addf %19, %20 : vector<16x1xf32>
    %22 = math.rsqrt %21 : vector<16x1xf32>
    %23 = vector.broadcast %22 : vector<16x1xf32> to vector<16x128xf32>
    %24 = arith.mulf %12, %23 : vector<16x128xf32>
    %25 = vector.broadcast %2 : vector<1x128xf32> to vector<16x128xf32>
    %26 = arith.mulf %24, %25 : vector<16x128xf32>
    %27 = vector.broadcast %3 : vector<1x128xf32> to vector<16x128xf32>
    %28 = arith.addf %26, %27 : vector<16x128xf32>
    %cst_10 = arith.constant 0.000000e+00 : f32
    %29 = vector.broadcast %cst_10 : f32 to vector<16x128xf32>
    %30 = arith.maximumf %28, %29 : vector<16x128xf32>
    %31 = arith.truncf %30 : vector<16x128xf32> to vector<16x128xbf16>
    %c0_11 = arith.constant 0 : index
    %c0_12 = arith.constant 0 : index
    %32 = vector.load %arg4[%c0_11, %c0_12] : memref<128x128xbf16, #tpu.memory_space<vmem>>, vector<128x128xbf16>
    %cst_13 = arith.constant dense<0.000000e+00> : vector<16x128xf32>
    %33 = tpu.matmul %31, %32, %cst_13 {dimension_numbers = #tpu.dot_dimension_numbers<[1], [0], [0], [1], [0, 0, 1, 1], [], []>} : vector<16x128xbf16>, vector<128x128xbf16>, vector<16x128xf32> -> vector<16x128xf32>
    %c0_14 = arith.constant 0 : index
    %c0_15 = arith.constant 0 : index
    %34 = vector.load %arg5[%c0_14, %c0_15] : memref<1x128xf32, #tpu.memory_space<vmem>>, vector<1x128xf32>
    %35 = vector.broadcast %34 : vector<1x128xf32> to vector<16x128xf32>
    %36 = arith.addf %33, %35 : vector<16x128xf32>
    %c0_16 = arith.constant 0 : index
    %c0_17 = arith.constant 0 : index
    %37 = vector.load %arg6[%c0_16, %c0_17] : memref<1x128xf32, #tpu.memory_space<vmem>>, vector<1x128xf32>
    %c0_18 = arith.constant 0 : index
    %c0_19 = arith.constant 0 : index
    %38 = vector.load %arg7[%c0_18, %c0_19] : memref<1x128xf32, #tpu.memory_space<vmem>>, vector<1x128xf32>
    %39 = tpu.iota {dimensions = array<i32: 1>} : vector<16x128xi32>
    %c16_i32 = arith.constant 16 : i32
    %40 = vector.broadcast %c16_i32 : i32 to vector<16x128xi32>
    %41 = arith.cmpi slt, %39, %40 : vector<16x128xi32>
    %cst_20 = arith.constant dense<0.000000e+00> : vector<16xf32>
    %42 = vector.multi_reduction <add>, %36, %cst_20 [1] : vector<16x128xf32> to vector<16xf32>
    %43 = vector.shape_cast %42 : vector<16xf32> to vector<16x1xf32>
    %cst_21 = arith.constant 1.600000e+01 : f32
    %44 = vector.broadcast %cst_21 : f32 to vector<16x1xf32>
    %45 = arith.divf %43, %44 : vector<16x1xf32>
    %46 = vector.broadcast %45 : vector<16x1xf32> to vector<16x128xf32>
    %47 = arith.subf %36, %46 : vector<16x128xf32>
    %cst_22 = arith.constant 0.000000e+00 : f32
    %48 = vector.broadcast %cst_22 : f32 to vector<16x128xf32>
    %49 = arith.select %41, %47, %48 : vector<16x128xi1>, vector<16x128xf32>
    %50 = arith.mulf %49, %49 : vector<16x128xf32>
    %cst_23 = arith.constant dense<0.000000e+00> : vector<16xf32>
    %51 = vector.multi_reduction <add>, %50, %cst_23 [1] : vector<16x128xf32> to vector<16xf32>
    %52 = vector.shape_cast %51 : vector<16xf32> to vector<16x1xf32>
    %cst_24 = arith.constant 1.600000e+01 : f32
    %53 = vector.broadcast %cst_24 : f32 to vector<16x1xf32>
    %54 = arith.divf %52, %53 : vector<16x1xf32>
    %cst_25 = arith.constant 9.99999974E-6 : f32
    %55 = vector.broadcast %cst_25 : f32 to vector<16x1xf32>
    %56 = arith.addf %54, %55 : vector<16x1xf32>
    %57 = math.rsqrt %56 : vector<16x1xf32>
    %58 = vector.broadcast %57 : vector<16x1xf32> to vector<16x128xf32>
    %59 = arith.mulf %47, %58 : vector<16x128xf32>
    %60 = vector.broadcast %37 : vector<1x128xf32> to vector<16x128xf32>
    %61 = arith.mulf %59, %60 : vector<16x128xf32>
    %62 = vector.broadcast %38 : vector<1x128xf32> to vector<16x128xf32>
    %63 = arith.addf %61, %62 : vector<16x128xf32>
    %cst_26 = arith.constant 0.000000e+00 : f32
    %64 = vector.broadcast %cst_26 : f32 to vector<16x128xf32>
    %65 = arith.maximumf %63, %64 : vector<16x128xf32>
    %66 = arith.truncf %65 : vector<16x128xf32> to vector<16x128xbf16>
    %c0_27 = arith.constant 0 : index
    %c0_28 = arith.constant 0 : index
    %67 = vector.load %arg8[%c0_27, %c0_28] : memref<16x128xbf16, #tpu.memory_space<vmem>>, vector<16x128xbf16>
    tpu.vector_store %arg8[%c0_27, %c0_28], %66 {strides = array<i32>} : memref<16x128xbf16, #tpu.memory_space<vmem>>, vector<16x128xbf16>,
    return
  }
  func.func @transform_0(%arg0: i32) -> (i32, i32) {
    %c0_i32 = arith.constant 0 : i32
    %c0_i32_0 = arith.constant 0 : i32
    return %arg0, %c0_i32 : i32, i32
  }
  func.func @transform_1(%arg0: i32) -> (i32, i32) {
    %c0_i32 = arith.constant 0 : i32
    %c0_i32_0 = arith.constant 0 : i32
    %c0_i32_1 = arith.constant 0 : i32
    return %c0_i32, %c0_i32_0 : i32, i32
  }
  func.func @transform_2(%arg0: i32) -> (i32, i32) {
    %c0_i32 = arith.constant 0 : i32
    %c0_i32_0 = arith.constant 0 : i32
    %c0_i32_1 = arith.constant 0 : i32
    return %c0_i32, %c0_i32_0 : i32, i32
  }
  func.func @transform_3(%arg0: i32) -> (i32, i32) {
    %c0_i32 = arith.constant 0 : i32
    %c0_i32_0 = arith.constant 0 : i32
    %c0_i32_1 = arith.constant 0 : i32
    return %c0_i32, %c0_i32_0 : i32, i32
  }
  func.func @transform_4(%arg0: i32) -> (i32, i32) {
    %c0_i32 = arith.constant 0 : i32
    %c0_i32_0 = arith.constant 0 : i32
    %c0_i32_1 = arith.constant 0 : i32
    return %c0_i32, %c0_i32_0 : i32, i32
  }
  func.func @transform_5(%arg0: i32) -> (i32, i32) {
    %c0_i32 = arith.constant 0 : i32
    %c0_i32_0 = arith.constant 0 : i32
    %c0_i32_1 = arith.constant 0 : i32
    return %c0_i32, %c0_i32_0 : i32, i32
  }
  func.func @transform_6(%arg0: i32) -> (i32, i32) {
    %c0_i32 = arith.constant 0 : i32
    %c0_i32_0 = arith.constant 0 : i32
    %c0_i32_1 = arith.constant 0 : i32
    return %c0_i32, %c0_i32_0 : i32, i32
  }
  func.func @transform_7(%arg0: i32) -> (i32, i32) {
    %c0_i32 = arith.constant 0 : i32
    %c0_i32_0 = arith.constant 0 : i32
    return %arg0, %c0_i32 : i32, i32
  }
}

module attributes {stable_mosaic.version = 11 : i64} {
  func.func @_dilated_conv_kernel(%arg0: i32, %arg1: memref<1x8x128xbf16, #tpu.memory_space<vmem>>, %arg2: memref<640x128xbf16, #tpu.memory_space<vmem>>, %arg3: memref<1x128xf32, #tpu.memory_space<vmem>>, %arg4: memref<1x8x128xbf16, #tpu.memory_space<vmem>>) attributes {dimension_semantics = [#tpu.dimension_semantics<parallel>], iteration_bounds = array<i64: 2>, scalar_prefetch = 0 : i64, scratch_operands = 0 : i64, tpu.core_type = #tpu.core_type<tc>, window_params = [{transform_indices = @transform_0, window_bounds = array<i64: 1, 8, 128>}, {pipeline_mode = #tpu.pipeline_mode<synchronous>, transform_indices = @transform_1, window_bounds = array<i64: 640, 128>}, {pipeline_mode = #tpu.pipeline_mode<synchronous>, transform_indices = @transform_2, window_bounds = array<i64: 1, 128>}, {transform_indices = @transform_3, window_bounds = array<i64: 1, 8, 128>}]} {
    %c0 = arith.constant 0 : index
    %c0_0 = arith.constant 0 : index
    %c0_1 = arith.constant 0 : index
    %0 = vector.load %arg1[%c0, %c0_0, %c0_1] : memref<1x8x128xbf16, #tpu.memory_space<vmem>>, vector<1x8x128xbf16>
    %1 = vector.shape_cast %0 : vector<1x8x128xbf16> to vector<8x128xbf16>
    %2 = arith.extf %1 : vector<8x128xbf16> to vector<8x128xf32>
    %cst = arith.constant 0.000000e+00 : f32
    %3 = vector.broadcast %cst : f32 to vector<2x128xf32>
    %4 = tpu.concatenate %3, %2, %3 in 0 : vector<2x128xf32>, vector<8x128xf32>, vector<2x128xf32> -> vector<12x128xf32>
    %5 = vector.extract_strided_slice %4 {offsets = [0, 0], sizes = [8, 128], strides = [1, 1]} : vector<12x128xf32> to vector<8x128xf32>
    %6 = vector.extract_strided_slice %4 {offsets = [1, 0], sizes = [8, 128], strides = [1, 1]} : vector<12x128xf32> to vector<8x128xf32>
    %7 = vector.extract_strided_slice %4 {offsets = [2, 0], sizes = [8, 128], strides = [1, 1]} : vector<12x128xf32> to vector<8x128xf32>
    %8 = vector.extract_strided_slice %4 {offsets = [3, 0], sizes = [8, 128], strides = [1, 1]} : vector<12x128xf32> to vector<8x128xf32>
    %9 = vector.extract_strided_slice %4 {offsets = [4, 0], sizes = [8, 128], strides = [1, 1]} : vector<12x128xf32> to vector<8x128xf32>
    %10 = tpu.concatenate %5, %6, %7, %8, %9 in 1 : vector<8x128xf32>, vector<8x128xf32>, vector<8x128xf32>, vector<8x128xf32>, vector<8x128xf32> -> vector<8x640xf32>
    %11 = arith.truncf %10 : vector<8x640xf32> to vector<8x640xbf16>
    %c0_2 = arith.constant 0 : index
    %c0_3 = arith.constant 0 : index
    %12 = vector.load %arg2[%c0_2, %c0_3] : memref<640x128xbf16, #tpu.memory_space<vmem>>, vector<640x128xbf16>
    %cst_4 = arith.constant dense<0.000000e+00> : vector<8x128xf32>
    %13 = tpu.matmul %11, %12, %cst_4 {dimension_numbers = #tpu.dot_dimension_numbers<[1], [0], [0], [1], [0, 0, 1, 1], [], []>} : vector<8x640xbf16>, vector<640x128xbf16>, vector<8x128xf32> -> vector<8x128xf32>
    %c0_5 = arith.constant 0 : index
    %c0_6 = arith.constant 0 : index
    %14 = vector.load %arg3[%c0_5, %c0_6] : memref<1x128xf32, #tpu.memory_space<vmem>>, vector<1x128xf32>
    %15 = vector.broadcast %14 : vector<1x128xf32> to vector<8x128xf32>
    %16 = arith.addf %13, %15 : vector<8x128xf32>
    %17 = arith.truncf %16 : vector<8x128xf32> to vector<8x128xbf16>
    %c0_7 = arith.constant 0 : index
    %c0_8 = arith.constant 0 : index
    %c0_9 = arith.constant 0 : index
    %18 = vector.load %arg4[%c0_7, %c0_8, %c0_9] : memref<1x8x128xbf16, #tpu.memory_space<vmem>>, vector<1x8x128xbf16>
    %19 = vector.shape_cast %18 : vector<1x8x128xbf16> to vector<8x128xbf16>
    %20 = vector.shape_cast %17 : vector<8x128xbf16> to vector<1x8x128xbf16>
    tpu.vector_store %arg4[%c0_7, %c0_8, %c0_9], %20 {strides = array<i32>} : memref<1x8x128xbf16, #tpu.memory_space<vmem>>, vector<1x8x128xbf16>,
    return
  }
  func.func @transform_0(%arg0: i32) -> (i32, i32, i32) {
    %c0_i32 = arith.constant 0 : i32
    %c0_i32_0 = arith.constant 0 : i32
    %c0_i32_1 = arith.constant 0 : i32
    return %arg0, %c0_i32, %c0_i32_0 : i32, i32, i32
  }
  func.func @transform_1(%arg0: i32) -> (i32, i32) {
    %c0_i32 = arith.constant 0 : i32
    %c0_i32_0 = arith.constant 0 : i32
    %c0_i32_1 = arith.constant 0 : i32
    return %c0_i32, %c0_i32_0 : i32, i32
  }
  func.func @transform_2(%arg0: i32) -> (i32, i32) {
    %c0_i32 = arith.constant 0 : i32
    %c0_i32_0 = arith.constant 0 : i32
    %c0_i32_1 = arith.constant 0 : i32
    return %c0_i32, %c0_i32_0 : i32, i32
  }
  func.func @transform_3(%arg0: i32) -> (i32, i32, i32) {
    %c0_i32 = arith.constant 0 : i32
    %c0_i32_0 = arith.constant 0 : i32
    %c0_i32_1 = arith.constant 0 : i32
    return %arg0, %c0_i32, %c0_i32_0 : i32, i32, i32
  }
}

module attributes {stable_mosaic.version = 11 : i64} {
  func.func @_ln_mm_res_kernel(%arg0: i32, %arg1: memref<16x128xbf16, #tpu.memory_space<vmem>>, %arg2: memref<1x128xf32, #tpu.memory_space<vmem>>, %arg3: memref<1x128xf32, #tpu.memory_space<vmem>>, %arg4: memref<128x128xbf16, #tpu.memory_space<vmem>>, %arg5: memref<1x128xf32, #tpu.memory_space<vmem>>, %arg6: memref<16x128xbf16, #tpu.memory_space<vmem>>, %arg7: memref<16x128xbf16, #tpu.memory_space<vmem>>) attributes {dimension_semantics = [#tpu.dimension_semantics<parallel>], iteration_bounds = array<i64: 1>, scalar_prefetch = 0 : i64, scratch_operands = 0 : i64, tpu.core_type = #tpu.core_type<tc>, window_params = [{transform_indices = @transform_0, window_bounds = array<i64: 16, 128>}, {pipeline_mode = #tpu.pipeline_mode<synchronous>, transform_indices = @transform_1, window_bounds = array<i64: 1, 128>}, {pipeline_mode = #tpu.pipeline_mode<synchronous>, transform_indices = @transform_2, window_bounds = array<i64: 1, 128>}, {pipeline_mode = #tpu.pipeline_mode<synchronous>, transform_indices = @transform_3, window_bounds = array<i64: 128, 128>}, {pipeline_mode = #tpu.pipeline_mode<synchronous>, transform_indices = @transform_4, window_bounds = array<i64: 1, 128>}, {transform_indices = @transform_5, window_bounds = array<i64: 16, 128>}, {transform_indices = @transform_6, window_bounds = array<i64: 16, 128>}]} {
    %c0 = arith.constant 0 : index
    %c0_0 = arith.constant 0 : index
    %0 = vector.load %arg1[%c0, %c0_0] : memref<16x128xbf16, #tpu.memory_space<vmem>>, vector<16x128xbf16>
    %1 = arith.extf %0 : vector<16x128xbf16> to vector<16x128xf32>
    %c0_1 = arith.constant 0 : index
    %c0_2 = arith.constant 0 : index
    %2 = vector.load %arg2[%c0_1, %c0_2] : memref<1x128xf32, #tpu.memory_space<vmem>>, vector<1x128xf32>
    %c0_3 = arith.constant 0 : index
    %c0_4 = arith.constant 0 : index
    %3 = vector.load %arg3[%c0_3, %c0_4] : memref<1x128xf32, #tpu.memory_space<vmem>>, vector<1x128xf32>
    %4 = tpu.iota {dimensions = array<i32: 1>} : vector<16x128xi32>
    %c16_i32 = arith.constant 16 : i32
    %5 = vector.broadcast %c16_i32 : i32 to vector<16x128xi32>
    %6 = arith.cmpi slt, %4, %5 : vector<16x128xi32>
    %cst = arith.constant dense<0.000000e+00> : vector<16xf32>
    %7 = vector.multi_reduction <add>, %1, %cst [1] : vector<16x128xf32> to vector<16xf32>
    %8 = vector.shape_cast %7 : vector<16xf32> to vector<16x1xf32>
    %cst_5 = arith.constant 1.600000e+01 : f32
    %9 = vector.broadcast %cst_5 : f32 to vector<16x1xf32>
    %10 = arith.divf %8, %9 : vector<16x1xf32>
    %11 = vector.broadcast %10 : vector<16x1xf32> to vector<16x128xf32>
    %12 = arith.subf %1, %11 : vector<16x128xf32>
    %cst_6 = arith.constant 0.000000e+00 : f32
    %13 = vector.broadcast %cst_6 : f32 to vector<16x128xf32>
    %14 = arith.select %6, %12, %13 : vector<16x128xi1>, vector<16x128xf32>
    %15 = arith.mulf %14, %14 : vector<16x128xf32>
    %cst_7 = arith.constant dense<0.000000e+00> : vector<16xf32>
    %16 = vector.multi_reduction <add>, %15, %cst_7 [1] : vector<16x128xf32> to vector<16xf32>
    %17 = vector.shape_cast %16 : vector<16xf32> to vector<16x1xf32>
    %cst_8 = arith.constant 1.600000e+01 : f32
    %18 = vector.broadcast %cst_8 : f32 to vector<16x1xf32>
    %19 = arith.divf %17, %18 : vector<16x1xf32>
    %cst_9 = arith.constant 9.99999974E-6 : f32
    %20 = vector.broadcast %cst_9 : f32 to vector<16x1xf32>
    %21 = arith.addf %19, %20 : vector<16x1xf32>
    %22 = math.rsqrt %21 : vector<16x1xf32>
    %23 = vector.broadcast %22 : vector<16x1xf32> to vector<16x128xf32>
    %24 = arith.mulf %12, %23 : vector<16x128xf32>
    %25 = vector.broadcast %2 : vector<1x128xf32> to vector<16x128xf32>
    %26 = arith.mulf %24, %25 : vector<16x128xf32>
    %27 = vector.broadcast %3 : vector<1x128xf32> to vector<16x128xf32>
    %28 = arith.addf %26, %27 : vector<16x128xf32>
    %cst_10 = arith.constant 0.000000e+00 : f32
    %29 = vector.broadcast %cst_10 : f32 to vector<16x128xf32>
    %30 = arith.maximumf %28, %29 : vector<16x128xf32>
    %31 = arith.truncf %30 : vector<16x128xf32> to vector<16x128xbf16>
    %c0_11 = arith.constant 0 : index
    %c0_12 = arith.constant 0 : index
    %32 = vector.load %arg4[%c0_11, %c0_12] : memref<128x128xbf16, #tpu.memory_space<vmem>>, vector<128x128xbf16>
    %cst_13 = arith.constant dense<0.000000e+00> : vector<16x128xf32>
    %33 = tpu.matmul %31, %32, %cst_13 {dimension_numbers = #tpu.dot_dimension_numbers<[1], [0], [0], [1], [0, 0, 1, 1], [], []>} : vector<16x128xbf16>, vector<128x128xbf16>, vector<16x128xf32> -> vector<16x128xf32>
    %c0_14 = arith.constant 0 : index
    %c0_15 = arith.constant 0 : index
    %34 = vector.load %arg5[%c0_14, %c0_15] : memref<1x128xf32, #tpu.memory_space<vmem>>, vector<1x128xf32>
    %35 = vector.broadcast %34 : vector<1x128xf32> to vector<16x128xf32>
    %36 = arith.addf %33, %35 : vector<16x128xf32>
    %c0_16 = arith.constant 0 : index
    %c0_17 = arith.constant 0 : index
    %37 = vector.load %arg6[%c0_16, %c0_17] : memref<16x128xbf16, #tpu.memory_space<vmem>>, vector<16x128xbf16>
    %38 = arith.extf %37 : vector<16x128xbf16> to vector<16x128xf32>
    %39 = arith.addf %36, %38 : vector<16x128xf32>
    %40 = arith.truncf %39 : vector<16x128xf32> to vector<16x128xbf16>
    %c0_18 = arith.constant 0 : index
    %c0_19 = arith.constant 0 : index
    %41 = vector.load %arg7[%c0_18, %c0_19] : memref<16x128xbf16, #tpu.memory_space<vmem>>, vector<16x128xbf16>
    tpu.vector_store %arg7[%c0_18, %c0_19], %40 {strides = array<i32>} : memref<16x128xbf16, #tpu.memory_space<vmem>>, vector<16x128xbf16>,
    return
  }
  func.func @transform_0(%arg0: i32) -> (i32, i32) {
    %c0_i32 = arith.constant 0 : i32
    %c0_i32_0 = arith.constant 0 : i32
    return %arg0, %c0_i32 : i32, i32
  }
  func.func @transform_1(%arg0: i32) -> (i32, i32) {
    %c0_i32 = arith.constant 0 : i32
    %c0_i32_0 = arith.constant 0 : i32
    %c0_i32_1 = arith.constant 0 : i32
    return %c0_i32, %c0_i32_0 : i32, i32
  }
  func.func @transform_2(%arg0: i32) -> (i32, i32) {
    %c0_i32 = arith.constant 0 : i32
    %c0_i32_0 = arith.constant 0 : i32
    %c0_i32_1 = arith.constant 0 : i32
    return %c0_i32, %c0_i32_0 : i32, i32
  }
  func.func @transform_3(%arg0: i32) -> (i32, i32) {
    %c0_i32 = arith.constant 0 : i32
    %c0_i32_0 = arith.constant 0 : i32
    %c0_i32_1 = arith.constant 0 : i32
    return %c0_i32, %c0_i32_0 : i32, i32
  }
  func.func @transform_4(%arg0: i32) -> (i32, i32) {
    %c0_i32 = arith.constant 0 : i32
    %c0_i32_0 = arith.constant 0 : i32
    %c0_i32_1 = arith.constant 0 : i32
    return %c0_i32, %c0_i32_0 : i32, i32
  }
  func.func @transform_5(%arg0: i32) -> (i32, i32) {
    %c0_i32 = arith.constant 0 : i32
    %c0_i32_0 = arith.constant 0 : i32
    return %arg0, %c0_i32 : i32, i32
  }
  func.func @transform_6(%arg0: i32) -> (i32, i32) {
    %c0_i32 = arith.constant 0 : i32
    %c0_i32_0 = arith.constant 0 : i32
    return %arg0, %c0_i32 : i32, i32
  }
}

module attributes {stable_mosaic.version = 11 : i64} {
  func.func @_dilated_conv_kernel(%arg0: i32, %arg1: memref<1x8x128xbf16, #tpu.memory_space<vmem>>, %arg2: memref<640x128xbf16, #tpu.memory_space<vmem>>, %arg3: memref<1x128xf32, #tpu.memory_space<vmem>>, %arg4: memref<1x8x128xbf16, #tpu.memory_space<vmem>>) attributes {dimension_semantics = [#tpu.dimension_semantics<parallel>], iteration_bounds = array<i64: 2>, scalar_prefetch = 0 : i64, scratch_operands = 0 : i64, tpu.core_type = #tpu.core_type<tc>, window_params = [{transform_indices = @transform_0, window_bounds = array<i64: 1, 8, 128>}, {pipeline_mode = #tpu.pipeline_mode<synchronous>, transform_indices = @transform_1, window_bounds = array<i64: 640, 128>}, {pipeline_mode = #tpu.pipeline_mode<synchronous>, transform_indices = @transform_2, window_bounds = array<i64: 1, 128>}, {transform_indices = @transform_3, window_bounds = array<i64: 1, 8, 128>}]} {
    %c0 = arith.constant 0 : index
    %c0_0 = arith.constant 0 : index
    %c0_1 = arith.constant 0 : index
    %0 = vector.load %arg1[%c0, %c0_0, %c0_1] : memref<1x8x128xbf16, #tpu.memory_space<vmem>>, vector<1x8x128xbf16>
    %1 = vector.shape_cast %0 : vector<1x8x128xbf16> to vector<8x128xbf16>
    %2 = arith.extf %1 : vector<8x128xbf16> to vector<8x128xf32>
    %cst = arith.constant 0.000000e+00 : f32
    %3 = vector.broadcast %cst : f32 to vector<4x128xf32>
    %4 = tpu.concatenate %3, %2, %3 in 0 : vector<4x128xf32>, vector<8x128xf32>, vector<4x128xf32> -> vector<16x128xf32>
    %5 = vector.extract_strided_slice %4 {offsets = [0, 0], sizes = [8, 128], strides = [1, 1]} : vector<16x128xf32> to vector<8x128xf32>
    %6 = vector.extract_strided_slice %4 {offsets = [2, 0], sizes = [8, 128], strides = [1, 1]} : vector<16x128xf32> to vector<8x128xf32>
    %7 = vector.extract_strided_slice %4 {offsets = [4, 0], sizes = [8, 128], strides = [1, 1]} : vector<16x128xf32> to vector<8x128xf32>
    %8 = vector.extract_strided_slice %4 {offsets = [6, 0], sizes = [8, 128], strides = [1, 1]} : vector<16x128xf32> to vector<8x128xf32>
    %9 = vector.extract_strided_slice %4 {offsets = [8, 0], sizes = [8, 128], strides = [1, 1]} : vector<16x128xf32> to vector<8x128xf32>
    %10 = tpu.concatenate %5, %6, %7, %8, %9 in 1 : vector<8x128xf32>, vector<8x128xf32>, vector<8x128xf32>, vector<8x128xf32>, vector<8x128xf32> -> vector<8x640xf32>
    %11 = arith.truncf %10 : vector<8x640xf32> to vector<8x640xbf16>
    %c0_2 = arith.constant 0 : index
    %c0_3 = arith.constant 0 : index
    %12 = vector.load %arg2[%c0_2, %c0_3] : memref<640x128xbf16, #tpu.memory_space<vmem>>, vector<640x128xbf16>
    %cst_4 = arith.constant dense<0.000000e+00> : vector<8x128xf32>
    %13 = tpu.matmul %11, %12, %cst_4 {dimension_numbers = #tpu.dot_dimension_numbers<[1], [0], [0], [1], [0, 0, 1, 1], [], []>} : vector<8x640xbf16>, vector<640x128xbf16>, vector<8x128xf32> -> vector<8x128xf32>
    %c0_5 = arith.constant 0 : index
    %c0_6 = arith.constant 0 : index
    %14 = vector.load %arg3[%c0_5, %c0_6] : memref<1x128xf32, #tpu.memory_space<vmem>>, vector<1x128xf32>
    %15 = vector.broadcast %14 : vector<1x128xf32> to vector<8x128xf32>
    %16 = arith.addf %13, %15 : vector<8x128xf32>
    %17 = arith.truncf %16 : vector<8x128xf32> to vector<8x128xbf16>
    %c0_7 = arith.constant 0 : index
    %c0_8 = arith.constant 0 : index
    %c0_9 = arith.constant 0 : index
    %18 = vector.load %arg4[%c0_7, %c0_8, %c0_9] : memref<1x8x128xbf16, #tpu.memory_space<vmem>>, vector<1x8x128xbf16>
    %19 = vector.shape_cast %18 : vector<1x8x128xbf16> to vector<8x128xbf16>
    %20 = vector.shape_cast %17 : vector<8x128xbf16> to vector<1x8x128xbf16>
    tpu.vector_store %arg4[%c0_7, %c0_8, %c0_9], %20 {strides = array<i32>} : memref<1x8x128xbf16, #tpu.memory_space<vmem>>, vector<1x8x128xbf16>,
    return
  }
  func.func @transform_0(%arg0: i32) -> (i32, i32, i32) {
    %c0_i32 = arith.constant 0 : i32
    %c0_i32_0 = arith.constant 0 : i32
    %c0_i32_1 = arith.constant 0 : i32
    return %arg0, %c0_i32, %c0_i32_0 : i32, i32, i32
  }
  func.func @transform_1(%arg0: i32) -> (i32, i32) {
    %c0_i32 = arith.constant 0 : i32
    %c0_i32_0 = arith.constant 0 : i32
    %c0_i32_1 = arith.constant 0 : i32
    return %c0_i32, %c0_i32_0 : i32, i32
  }
  func.func @transform_2(%arg0: i32) -> (i32, i32) {
    %c0_i32 = arith.constant 0 : i32
    %c0_i32_0 = arith.constant 0 : i32
    %c0_i32_1 = arith.constant 0 : i32
    return %c0_i32, %c0_i32_0 : i32, i32
  }
  func.func @transform_3(%arg0: i32) -> (i32, i32, i32) {
    %c0_i32 = arith.constant 0 : i32
    %c0_i32_0 = arith.constant 0 : i32
    %c0_i32_1 = arith.constant 0 : i32
    return %arg0, %c0_i32, %c0_i32_0 : i32, i32, i32
  }
}

module attributes {stable_mosaic.version = 11 : i64} {
  func.func @_mm_bias_kernel(%arg0: i32, %arg1: memref<16x128xbf16, #tpu.memory_space<vmem>>, %arg2: memref<128x128xbf16, #tpu.memory_space<vmem>>, %arg3: memref<1x128xf32, #tpu.memory_space<vmem>>, %arg4: memref<16x128xbf16, #tpu.memory_space<vmem>>) attributes {dimension_semantics = [#tpu.dimension_semantics<parallel>], iteration_bounds = array<i64: 1>, scalar_prefetch = 0 : i64, scratch_operands = 0 : i64, tpu.core_type = #tpu.core_type<tc>, window_params = [{transform_indices = @transform_0, window_bounds = array<i64: 16, 128>}, {pipeline_mode = #tpu.pipeline_mode<synchronous>, transform_indices = @transform_1, window_bounds = array<i64: 128, 128>}, {pipeline_mode = #tpu.pipeline_mode<synchronous>, transform_indices = @transform_2, window_bounds = array<i64: 1, 128>}, {transform_indices = @transform_3, window_bounds = array<i64: 16, 128>}]} {
    %c0 = arith.constant 0 : index
    %c0_0 = arith.constant 0 : index
    %0 = vector.load %arg1[%c0, %c0_0] : memref<16x128xbf16, #tpu.memory_space<vmem>>, vector<16x128xbf16>
    %c0_1 = arith.constant 0 : index
    %c0_2 = arith.constant 0 : index
    %1 = vector.load %arg2[%c0_1, %c0_2] : memref<128x128xbf16, #tpu.memory_space<vmem>>, vector<128x128xbf16>
    %cst = arith.constant dense<0.000000e+00> : vector<16x128xf32>
    %2 = tpu.matmul %0, %1, %cst {dimension_numbers = #tpu.dot_dimension_numbers<[1], [0], [0], [1], [0, 0, 1, 1], [], []>} : vector<16x128xbf16>, vector<128x128xbf16>, vector<16x128xf32> -> vector<16x128xf32>
    %c0_3 = arith.constant 0 : index
    %c0_4 = arith.constant 0 : index
    %3 = vector.load %arg3[%c0_3, %c0_4] : memref<1x128xf32, #tpu.memory_space<vmem>>, vector<1x128xf32>
    %4 = vector.broadcast %3 : vector<1x128xf32> to vector<16x128xf32>
    %5 = arith.addf %2, %4 : vector<16x128xf32>
    %6 = arith.truncf %5 : vector<16x128xf32> to vector<16x128xbf16>
    %c0_5 = arith.constant 0 : index
    %c0_6 = arith.constant 0 : index
    %7 = vector.load %arg4[%c0_5, %c0_6] : memref<16x128xbf16, #tpu.memory_space<vmem>>, vector<16x128xbf16>
    tpu.vector_store %arg4[%c0_5, %c0_6], %6 {strides = array<i32>} : memref<16x128xbf16, #tpu.memory_space<vmem>>, vector<16x128xbf16>,
    return
  }
  func.func @transform_0(%arg0: i32) -> (i32, i32) {
    %c0_i32 = arith.constant 0 : i32
    %c0_i32_0 = arith.constant 0 : i32
    return %arg0, %c0_i32 : i32, i32
  }
  func.func @transform_1(%arg0: i32) -> (i32, i32) {
    %c0_i32 = arith.constant 0 : i32
    %c0_i32_0 = arith.constant 0 : i32
    %c0_i32_1 = arith.constant 0 : i32
    return %c0_i32, %c0_i32_0 : i32, i32
  }
  func.func @transform_2(%arg0: i32) -> (i32, i32) {
    %c0_i32 = arith.constant 0 : i32
    %c0_i32_0 = arith.constant 0 : i32
    %c0_i32_1 = arith.constant 0 : i32
    return %c0_i32, %c0_i32_0 : i32, i32
  }
  func.func @transform_3(%arg0: i32) -> (i32, i32) {
    %c0_i32 = arith.constant 0 : i32
    %c0_i32_0 = arith.constant 0 : i32
    return %arg0, %c0_i32 : i32, i32
  }
}

</mosaic_0001>

<bundles_post_ra>
// kernel: bytenet_lm_time_forward.8
= control target key start
LH: loop header
LB: loop body
LE: loop exit
PB: predicated region body
PF: predicated region fallthrough
CT: control target
= control target key end

     0   :  { %v208_v0 = vmov 0.0   ;;  %vm209_vm0 = vmmov 0   ;;  %s263_s1 = inlined_call_operand.vmem [shape: bf16[128,128], index: 1, kind: input, shape index: {}]   ;;  %s264_s0 = inlined_call_operand.vmem [shape: bf16[16,128], index: 0, kind: input, shape index: {}]   ;;  %s265_s2 = inlined_call_operand.vmem [shape: f32[1,128], index: 2, kind: input, shape index: {}]   ;;  %s266_s3 = inlined_call_operand.vmem [shape: bf16[16,128], index: 3, kind: output, shape index: {}]  }
   0x1   :  { %177 = vmatprep.subr.bf16.mxu0 %v208_v0  ;;  %v199_v1 = vld [vmem:[%s263_s1] sm:$0xff]   ;;  %193 = vmatprep.mubr.msk.bf16.mxu0 %vm209_vm0, %v208_v0  ;;  %v200_v2 = vld [vmem:[%s263_s1 + $0x8] sm:$0xff]   ;;  %v201_v3 = vld [vmem:[%s263_s1 + $0x10] sm:$0xff]  }
   0x2   :  { %178 = vmatpush3.bf16.msra.mxu0 %v199_v1  ;;  %v202_v4 = vld [vmem:[%s263_s1 + $0x18] sm:$0xff]   ;;  %v203_v5 = vld [vmem:[%s263_s1 + $0x20] sm:$0xff]   ;;  %v204_v6 = vld [vmem:[%s263_s1 + $0x28] sm:$0xff]  }
   0x3   :  { %179 = vmatprep.subr.bf16.mxu0 %v208_v0  ;;  %v205_v7 = vld [vmem:[%s263_s1 + $0x30] sm:$0xff]   ;;  %v206_v8 = vld [vmem:[%s263_s1 + $0x38] sm:$0xff]   ;;  %v207_v9 = vld [vmem:[%s264_s0] sm:$0xff]  }
   0x4   :  { %v149_v10 = vld [vmem:[%s265_s2] ss:$0 sm:$0xff] }
   0x6   :  { %180 = vmatpush3.bf16.msra.mxu0 %v200_v2 }
   0x7   :  { %181 = vmatprep.subr.bf16.mxu0 %v208_v0 }
   0xa   :  { %182 = vmatpush3.bf16.msra.mxu0 %v201_v3 }
   0xb   :  { %183 = vmatprep.subr.bf16.mxu0 %v208_v0 }
   0xe   :  { %184 = vmatpush3.bf16.msra.mxu0 %v202_v4 }
   0xf   :  { %185 = vmatprep.subr.bf16.mxu0 %v208_v0 }
  0x12   :  { %186 = vmatpush3.bf16.msra.mxu0 %v203_v5 }
  0x13   :  { %187 = vmatprep.subr.bf16.mxu0 %v208_v0 }
  0x16   :  { %188 = vmatpush3.bf16.msra.mxu0 %v204_v6 }
  0x17   :  { %189 = vmatprep.subr.bf16.mxu0 %v208_v0 }
  0x1a   :  { %190 = vmatpush3.bf16.msra.mxu0 %v205_v7 }
  0x1b   :  { %191 = vmatprep.subr.bf16.mxu0 %v208_v0 }
  0x1e   :  { %192 = vmatpush3.bf16.msra.mxu0 %v206_v8 }
  0x21   :  { %194 = vmatmul.mubr.bf16.vlgmr.msra.gmra.mrb[0].mxu0 %v207_v9 }
  0xf4   :  { %v128_v11 = vpop.f32.mrb[0].mxu0 }
  0xf5   :  { %v195_v12 = vpop.f32.mrb[1].mxu0  ;;  %v129_v14 = vadd.f32 %v149_v10, %v128_v11 }
  0xf6   :  { %v131_v13 = vpop.f32.mrb[2].mxu0 }
  0xf7   :  { %v132_v15 = vadd.f32 %v149_v10, %v131_v13  ;;  %v196_v16 = vpop.f32.mrb[3].mxu0 }
  0xf9   :  { %v166_v17 = vpack.c.bf16 %v132_v15, %v129_v14 }
  0xfb   :  { %167 = vst [vmem:[%s266_s3] sm:$0xff] %v166_v17  }

// kernel: bytenet_lm_time_forward.9
= control target key start
LH: loop header
LB: loop body
LE: loop exit
PB: predicated region body
PF: predicated region fallthrough
CT: control target
= control target key end

     0   :  { %v325_v3 = vmov 0.0   ;;  %v33_v5 = vlaneseq  ;;  %vm326_vm1 = vmmov 0   ;;  %s416_s0 = inlined_call_operand.vmem [shape: bf16[16,128], index: 0, kind: input, shape index: {}]   ;;  %s417_s3 = inlined_call_operand.vmem [shape: bf16[128,128], index: 3, kind: input, shape index: {}]   ;;  %s418_s1 = inlined_call_operand.vmem [shape: f32[1,128], index: 1, kind: input, shape index: {}]   ;;  %s419_s2 = inlined_call_operand.vmem [shape: f32[1,128], index: 2, kind: input, shape index: {}]   ;;  %s420_s4 = inlined_call_operand.vmem [shape: f32[1,128], index: 4, kind: input, shape index: {}]   ;;  %s421_s5 = inlined_call_operand.vmem [shape: f32[1,128], index: 5, kind: input, shape index: {}]   ;;  %s422_s6 = inlined_call_operand.vmem [shape: f32[1,128], index: 6, kind: input, shape index: {}]   ;;  %s423_s7 = inlined_call_operand.vmem [shape: bf16[16,128], index: 7, kind: output, shape index: {}]  }
   0x1   :  { %v270_v0 = vld [vmem:[%s416_s0] sm:$0xff]   ;;  %287 = vmatprep.subr.bf16.mxu0 %v325_v3  ;;  %v310_v17 = vld [vmem:[%s417_s3 + $0x8] sm:$0xff]   ;;  %v311_v18 = vld [vmem:[%s417_s3 + $0x10] sm:$0xff]   ;;  %303 = vmatprep.mubr.msk.bf16.mxu0 %vm326_vm1, %v325_v3 }
   0x2   :  { %v271_v1 = vunpack.c.l.bf16 %v270_v0  ;;  %v272_v2 = vunpack.c.h.bf16 %v270_v0  ;;  %v309_v4 = vld [vmem:[%s417_s3] sm:$0xff]   ;;  %v373_v6 = vand.u32 127, %v33_v5  ;;  %v312_v19 = vld [vmem:[%s417_s3 + $0x18] sm:$0xff]   ;;  %v314_v21 = vld [vmem:[%s417_s3 + $0x28] sm:$0xff]  }
   0x3   :  { %288 = vmatpush3.bf16.msra.mxu0 %v309_v4  ;;  %v313_v20 = vld [vmem:[%s417_s3 + $0x20] sm:$0xff]   ;;  %v315_v22 = vld [vmem:[%s417_s3 + $0x30] sm:$0xff]   ;;  %v316_v23 = vld [vmem:[%s417_s3 + $0x38] sm:$0xff]  }
   0x4   :  { %36 = vadd.xlane.f32.xlu0 %v271_v1  ;;  %289 = vmatprep.subr.bf16.mxu0 %v325_v3  ;;  %vm35_vm0 = vcmp.lt.s32.totalorder %v373_v6, 32  ;;  %v252_v31 = vld [vmem:[%s418_s1] ss:$0 sm:$0xff]  ;;  %vm194_vm2 = vcmp.lt.s32.totalorder %v373_v6, 16 }
   0x5   :  { %v253_v35 = vld [vmem:[%s419_s2] ss:$0 sm:$0xff] }
   0x6   :  { %v254_v43 = vld [vmem:[%s420_s4] ss:$0 sm:$0xff] }
   0x7   :  { %290 = vmatpush3.bf16.msra.mxu0 %v310_v17  ;;  %v264_v6 = vld [vmem:[%s422_s6] ss:$0 sm:$0xff] }
   0x8   :  { %38 = vadd.xlane.f32.xlu0 %v272_v2  ;;  %291 = vmatprep.subr.bf16.mxu0 %v325_v3 }
   0xb   :  { %292 = vmatpush3.bf16.msra.mxu0 %v311_v18 }
   0xc   :  { %293 = vmatprep.subr.bf16.mxu0 %v325_v3 }
   0xf   :  { %294 = vmatpush3.bf16.msra.mxu0 %v312_v19 }
  0x10   :  { %295 = vmatprep.subr.bf16.mxu0 %v325_v3 }
  0x13   :  { %296 = vmatpush3.bf16.msra.mxu0 %v313_v20 }
  0x14   :  { %297 = vmatprep.subr.bf16.mxu0 %v325_v3 }
  0x17   :  { %298 = vmatpush3.bf16.msra.mxu0 %v314_v21 }
  0x18   :  { %299 = vmatprep.subr.bf16.mxu0 %v325_v3 }
  0x1b   :  { %300 = vmatpush3.bf16.msra.mxu0 %v315_v22 }
  0x1c   :  { %301 = vmatprep.subr.bf16.mxu0 %v325_v3  ;;  %v263_v3 = vld [vmem:[%s421_s5] ss:$0 sm:$0xff] }
  0x1f   :  { %302 = vmatpush3.bf16.msra.mxu0 %v316_v23 }
  0x91   :  { %v37_v7 = vpop.xlane.xlu0 %36 }
  0x92   :  { %v41_v8 = vmul.f32 0.03125, %v37_v7 }
  0x94   :  { %v43_v9 = vsub.f32 %v271_v1, %v41_v8 }
  0x95   :  { %v39_v10 = vpop.xlane.xlu0 %38 }
  0x96   :  { %v42_v11 = vmul.f32 0.03125, %v39_v10  ;;  %v45_v12 = vsel %vm35_vm0, %v43_v9, 0.0 }
  0x97   :  { %v47_v13 = vmul.f32 %v45_v12, %v45_v12 }
  0x98   :  { %v44_v14 = vsub.f32 %v272_v2, %v42_v11 }
  0x99   :  { %49 = vadd.xlane.f32.xlu1 %v47_v13 }
  0x9a   :  { %v46_v15 = vsel %vm35_vm0, %v44_v14, 0.0 }
  0x9b   :  { %v48_v16 = vmul.f32 %v46_v15, %v46_v15 }
  0x9d   :  { %51 = vadd.xlane.f32.xlu1 %v48_v16 }
 0x126   :  { %v50_v24 = vpop.xlane.xlu1 %49 }
 0x127   :  { %v53_v25 = vmul.f32 0.03125, %v50_v24 }
 0x129   :  { %v55_v26 = vadd.f32 1e-05, %v53_v25 }
 0x12a   :  { %v52_v27 = vpop.xlane.xlu1 %51 }
 0x12b   :  { %317 = vrsqrt.f32 %v55_v26  ;;  %v54_v28 = vmul.f32 0.03125, %v52_v27 }
 0x12d   :  { %v56_v29 = vadd.f32 1e-05, %v54_v28 }
 0x12f   :  { %319 = vrsqrt.f32 %v56_v29 }
 0x135   :  { %v318_v30 = vpop.eup %317 }
 0x136   :  { %v59_v32 = vmul.f32 %v318_v30, %v43_v9 }
 0x138   :  { %v67_v33 = vmul.f32 %v252_v31, %v59_v32 }
 0x139   :  { %v320_v34 = vpop.eup %319 }
 0x13a   :  { %v60_v36 = vmul.f32 %v320_v34, %v44_v14  ;;  %v75_v38 = vadd.f32 %v253_v35, %v67_v33 }
 0x13c   :  { %v68_v37 = vmul.f32 %v252_v31, %v60_v36  ;;  %v77_v40 = vmax.f32 %v75_v38, 0.0 }
 0x13e   :  { %v76_v39 = vadd.f32 %v253_v35, %v68_v37 }
 0x140   :  { %v78_v41 = vmax.f32 %v76_v39, 0.0 }
 0x142   :  { %v79_v42 = vpack.c.bf16 %v78_v41, %v77_v40 }
 0x144   :  { %304 = vmatmul.mubr.bf16.vlgmr.msra.gmra.mrb[0].mxu0 %v79_v42 }
 0x217   :  { %v185_v44 = vpop.f32.mrb[0].mxu0 }
 0x218   :  { %v186_v45 = vadd.f32 %v254_v43, %v185_v44  ;;  %v305_v46 = vpop.f32.mrb[1].mxu0 }
 0x219   :  { %v188_v47 = vpop.f32.mrb[2].mxu0 }
 0x21a   :  { %v189_v48 = vadd.f32 %v254_v43, %v188_v47  ;;  %195 = vadd.xlane.f32.xlu0 %v186_v45  ;;  %v306_v49 = vpop.f32.mrb[3].mxu0 }
 0x21c   :  { %197 = vadd.xlane.f32.xlu1 %v189_v48 }
 0x2a7   :  { %v196_v50 = vpop.xlane.xlu0 %195 }
 0x2a8   :  { %v200_v51 = vmul.f32 0.0625, %v196_v50 }
 0x2a9   :  { %v198_v52 = vpop.xlane.xlu1 %197 }
 0x2aa   :  { %v202_v53 = vsub.f32 %v186_v45, %v200_v51  ;;  %v201_v54 = vmul.f32 0.0625, %v198_v52 }
 0x2ac   :  { %v203_v55 = vsub.f32 %v189_v48, %v201_v54  ;;  %v204_v56 = vsel %vm194_vm2, %v202_v53, 0.0 }
 0x2ad   :  { %v206_v57 = vmul.f32 %v204_v56, %v204_v56 }
 0x2ae   :  { %v205_v58 = vsel %vm194_vm2, %v203_v55, 0.0 }
 0x2af   :  { %208 = vadd.xlane.f32.xlu0 %v206_v57  ;;  %v207_v59 = vmul.f32 %v205_v58, %v205_v58 }
 0x2b1   :  { %210 = vadd.xlane.f32.xlu1 %v207_v59 }
 0x33c   :  { %v209_v60 = vpop.xlane.xlu0 %208 }
 0x33d   :  { %v212_v61 = vmul.f32 0.0625, %v209_v60 }
 0x33e   :  { %v211_v62 = vpop.xlane.xlu1 %210 }
 0x33f   :  { %v214_v63 = vadd.f32 1e-05, %v212_v61  ;;  %v213_v0 = vmul.f32 0.0625, %v211_v62 }
 0x341   :  { %321 = vrsqrt.f32 %v214_v63  ;;  %v215_v1 = vadd.f32 1e-05, %v213_v0 }
 0x343   :  { %323 = vrsqrt.f32 %v215_v1 }
 0x34b   :  { %v322_v2 = vpop.eup %321 }
 0x34c   :  { %v218_v4 = vmul.f32 %v322_v2, %v202_v53 }
 0x34d   :  { %v324_v5 = vpop.eup %323 }
 0x34e   :  { %v226_v7 = vmul.f32 %v263_v3, %v218_v4  ;;  %v219_v8 = vmul.f32 %v324_v5, %v203_v55 }
 0x350   :  { %v234_v9 = vadd.f32 %v264_v6, %v226_v7  ;;  %v227_v10 = vmul.f32 %v263_v3, %v219_v8 }
 0x352   :  { %v235_v11 = vadd.f32 %v264_v6, %v227_v10  ;;  %v236_v12 = vmax.f32 %v234_v9, 0.0 }
 0x354   :  { %v237_v13 = vmax.f32 %v235_v11, 0.0 }
 0x356   :  { %v276_v14 = vpack.c.bf16 %v237_v13, %v236_v12 }
 0x358   :  { %277 = vst [vmem:[%s423_s7] sm:$0xff] %v276_v14  }

// kernel: bytenet_lm_time_forward.11
= control target key start
LH: loop header
LB: loop body
LE: loop exit
PB: predicated region body
PF: predicated region fallthrough
CT: control target
= control target key end

     0   :  { %v280_v3 = vmov 0.0   ;;  %v30_v5 = vlaneseq  ;;  %vm281_vm1 = vmmov 0   ;;  %s359_s0 = inlined_call_operand.vmem [shape: bf16[16,128], index: 0, kind: input, shape index: {}]   ;;  %s360_s3 = inlined_call_operand.vmem [shape: bf16[128,128], index: 3, kind: input, shape index: {}]   ;;  %s361_s1 = inlined_call_operand.vmem [shape: f32[1,128], index: 1, kind: input, shape index: {}]   ;;  %s362_s2 = inlined_call_operand.vmem [shape: f32[1,128], index: 2, kind: input, shape index: {}]   ;;  %s363_s4 = inlined_call_operand.vmem [shape: f32[1,128], index: 4, kind: input, shape index: {}]   ;;  %s364_s5 = inlined_call_operand.vmem [shape: bf16[16,128], index: 5, kind: input, shape index: {}]   ;;  %s365_s6 = inlined_call_operand.vmem [shape: bf16[16,128], index: 6, kind: output, shape index: {}]  }
   0x1   :  { %v225_v0 = vld [vmem:[%s359_s0] sm:$0xff]   ;;  %246 = vmatprep.subr.bf16.mxu0 %v280_v3  ;;  %v269_v17 = vld [vmem:[%s360_s3 + $0x8] sm:$0xff]   ;;  %v270_v18 = vld [vmem:[%s360_s3 + $0x10] sm:$0xff]   ;;  %262 = vmatprep.mubr.msk.bf16.mxu0 %vm281_vm1, %v280_v3 }
   0x2   :  { %v226_v1 = vunpack.c.l.bf16 %v225_v0  ;;  %v227_v2 = vunpack.c.h.bf16 %v225_v0  ;;  %v268_v4 = vld [vmem:[%s360_s3] sm:$0xff]   ;;  %v31_v6 = vand.u32 127, %v30_v5  ;;  %v271_v19 = vld [vmem:[%s360_s3 + $0x18] sm:$0xff]   ;;  %v273_v21 = vld [vmem:[%s360_s3 + $0x28] sm:$0xff]  }
   0x3   :  { %247 = vmatpush3.bf16.msra.mxu0 %v268_v4  ;;  %v272_v20 = vld [vmem:[%s360_s3 + $0x20] sm:$0xff]   ;;  %v274_v22 = vld [vmem:[%s360_s3 + $0x30] sm:$0xff]   ;;  %v275_v23 = vld [vmem:[%s360_s3 + $0x38] sm:$0xff]  }
   0x4   :  { %33 = vadd.xlane.f32.xlu0 %v226_v1  ;;  %248 = vmatprep.subr.bf16.mxu0 %v280_v3  ;;  %vm32_vm0 = vcmp.lt.s32.totalorder %v31_v6, 16  ;;  %v209_v31 = vld [vmem:[%s361_s1] ss:$0 sm:$0xff] }
   0x5   :  { %v210_v35 = vld [vmem:[%s362_s2] ss:$0 sm:$0xff] }
   0x6   :  { %v211_v43 = vld [vmem:[%s363_s4] ss:$0 sm:$0xff] }
   0x7   :  { %249 = vmatpush3.bf16.msra.mxu0 %v269_v17  ;;  %v229_v44 = vld [vmem:[%s364_s5] sm:$0xff]  }
   0x8   :  { %35 = vadd.xlane.f32.xlu0 %v227_v2  ;;  %250 = vmatprep.subr.bf16.mxu0 %v280_v3  ;;  %v230_v47 = vunpack.c.l.bf16 %v229_v44  ;;  %v231_v49 = vunpack.c.h.bf16 %v229_v44 }
   0xb   :  { %251 = vmatpush3.bf16.msra.mxu0 %v270_v18 }
   0xc   :  { %252 = vmatprep.subr.bf16.mxu0 %v280_v3 }
   0xf   :  { %253 = vmatpush3.bf16.msra.mxu0 %v271_v19 }
  0x10   :  { %254 = vmatprep.subr.bf16.mxu0 %v280_v3 }
  0x13   :  { %255 = vmatpush3.bf16.msra.mxu0 %v272_v20 }
  0x14   :  { %256 = vmatprep.subr.bf16.mxu0 %v280_v3 }
  0x17   :  { %257 = vmatpush3.bf16.msra.mxu0 %v273_v21 }
  0x18   :  { %258 = vmatprep.subr.bf16.mxu0 %v280_v3 }
  0x1b   :  { %259 = vmatpush3.bf16.msra.mxu0 %v274_v22 }
  0x1c   :  { %260 = vmatprep.subr.bf16.mxu0 %v280_v3 }
  0x1f   :  { %261 = vmatpush3.bf16.msra.mxu0 %v275_v23 }
  0x91   :  { %v34_v7 = vpop.xlane.xlu0 %33 }
  0x92   :  { %v38_v8 = vmul.f32 0.0625, %v34_v7 }
  0x94   :  { %v40_v9 = vsub.f32 %v226_v1, %v38_v8 }
  0x95   :  { %v36_v10 = vpop.xlane.xlu0 %35 }
  0x96   :  { %v39_v11 = vmul.f32 0.0625, %v36_v10  ;;  %v42_v12 = vsel %vm32_vm0, %v40_v9, 0.0 }
  0x97   :  { %v44_v13 = vmul.f32 %v42_v12, %v42_v12 }
  0x98   :  { %v41_v14 = vsub.f32 %v227_v2, %v39_v11 }
  0x99   :  { %46 = vadd.xlane.f32.xlu1 %v44_v13 }
  0x9a   :  { %v43_v15 = vsel %vm32_vm0, %v41_v14, 0.0 }
  0x9b   :  { %v45_v16 = vmul.f32 %v43_v15, %v43_v15 }
  0x9d   :  { %48 = vadd.xlane.f32.xlu1 %v45_v16 }
 0x126   :  { %v47_v24 = vpop.xlane.xlu1 %46 }
 0x127   :  { %v50_v25 = vmul.f32 0.0625, %v47_v24 }
 0x129   :  { %v52_v26 = vadd.f32 1e-05, %v50_v25 }
 0x12a   :  { %v49_v27 = vpop.xlane.xlu1 %48 }
 0x12b   :  { %276 = vrsqrt.f32 %v52_v26  ;;  %v51_v28 = vmul.f32 0.0625, %v49_v27 }
 0x12d   :  { %v53_v29 = vadd.f32 1e-05, %v51_v28 }
 0x12f   :  { %278 = vrsqrt.f32 %v53_v29 }
 0x135   :  { %v277_v30 = vpop.eup %276 }
 0x136   :  { %v56_v32 = vmul.f32 %v277_v30, %v40_v9 }
 0x138   :  { %v64_v33 = vmul.f32 %v209_v31, %v56_v32 }
 0x139   :  { %v279_v34 = vpop.eup %278 }
 0x13a   :  { %v57_v36 = vmul.f32 %v279_v34, %v41_v14  ;;  %v72_v38 = vadd.f32 %v210_v35, %v64_v33 }
 0x13c   :  { %v65_v37 = vmul.f32 %v209_v31, %v57_v36  ;;  %v74_v40 = vmax.f32 %v72_v38, 0.0 }
 0x13e   :  { %v73_v39 = vadd.f32 %v210_v35, %v65_v37 }
 0x140   :  { %v75_v41 = vmax.f32 %v73_v39, 0.0 }
 0x142   :  { %v76_v42 = vpack.c.bf16 %v75_v41, %v74_v40 }
 0x144   :  { %263 = vmatmul.mubr.bf16.vlgmr.msra.gmra.mrb[0].mxu0 %v76_v42 }
 0x217   :  { %v182_v45 = vpop.f32.mrb[0].mxu0 }
 0x218   :  { %v183_v46 = vadd.f32 %v211_v43, %v182_v45  ;;  %v264_v48 = vpop.f32.mrb[1].mxu0 }
 0x219   :  { %v185_v50 = vpop.f32.mrb[2].mxu0 }
 0x21a   :  { %v186_v51 = vadd.f32 %v211_v43, %v185_v50  ;;  %v265_v52 = vpop.f32.mrb[3].mxu0  ;;  %v193_v53 = vadd.f32 %v230_v47, %v183_v46 }
 0x21c   :  { %v194_v54 = vadd.f32 %v231_v49, %v186_v51 }
 0x21e   :  { %v235_v55 = vpack.c.bf16 %v194_v54, %v193_v53 }
 0x220   :  { %236 = vst [vmem:[%s365_s6] sm:$0xff] %v235_v55  }

// kernel: bytenet_lm_time_forward.10
= control target key start
LH: loop header
LB: loop body
LE: loop exit
PB: predicated region body
PF: predicated region fallthrough
CT: control target
= control target key end

     0   :  { %8 = vsyncpa [#allocation3], 0  ;;  %s989_s12 = smov 0   ;;  %s1062_s0 = inlined_call_operand.vmem [shape: bf16[2,8,128], index: 0, kind: input, shape index: {}]   ;;  %s1063_s1 = inlined_call_operand.hbm [shape: bf16[640,128], index: 1, kind: input, shape index: {}]   ;;  %s1064_s2 = inlined_call_operand.vmem [shape: f32[1,128], index: 2, kind: input, shape index: {}]   ;;  %s1065_s3 = inlined_call_operand.vmem [shape: bf16[2,8,128], index: 3, kind: output, shape index: {}]  }
   0x1 LB: > { %s995_s13 = sadd.s32 4294967295, %s962_s12   ;;  %p733_p0 = scmp.ge.s32.totalorder %s962_s12, 1  ;;  %s962_s12 = sphi %s989_s12, %s14_s12  }
   0x2   : > { %p113_p1 = scmp.lt.s32.totalorder %s962_s12, 3  ;;  %s964_s14 = smov [#allocation2]  }
   0x3   : > { %s125_s15 = sshll.u32 %s964_s14, 4  ;;  %p1066_p3 = scmp.eq.s32.totalorder %s995_s13, 0  ;;  %s126_s15 = int_to_ptr.vmem [resolvable:$true] %s125_s15 }
   0x4   : > { %p999_p2 = pnand %p733_p0, %p113_p1  ;;  %s924_s20 = scalar_lea.hbm %s1063_s1, 5120 }
   0x5   : > { %p925_p6 = scmp.ne.s32.totalorder %s1063_s1, %s924_s20  ;;  %p931_p10 = scmp.lt.u32.totalorder %s924_s20, %s1063_s1 }
   0x6   : > { %s1068_s16 = scalar_select %p999_p2, 1, 0 }
   0x7   : > { %p865_p4 = pneg %p999_p2 }
   0x9   : > { %p1008_p5 = pnand %p1066_p3, %p865_p4 }
   0xb   : > { %p926_p7 = pneg %p1008_p5 }
   0xd   : > { %p927_p8 = pnand %p926_p7, %p925_p6 }
   0xf   : > { %p928_p9 = pneg %p927_p8 }
  0x11   : > { %p933_p11 = pnand %p931_p10, %p928_p9 }
  0x13   : > { %936 = shalt.err (!%p933_p11)
}
  0x14   : > { %s937_s25 = scalar_lea.vmem %s126_s15, 5120  ;;  %p945_p1 = scmp.lt.s32.totalorder %s126_s15, %s126_s15 }
  0x15   : > { %p938_p12 = scmp.ne.s32.totalorder %s126_s15, %s937_s25  ;;  %p946_p4 = scmp.lt.s32.totalorder %s937_s25, %s937_s25 }
  0x17   : > { %p940_p13 = pnand %p938_p12, %p926_p7  ;;  %p947_p3 = por %p946_p4, %p945_p1 }
  0x19   : > { %p941_p0 = pneg %p940_p13 }
  0x1b   : > { %p948_p2 = pnand %p947_p3, %p941_p0 }
  0x1d   : > { %951 = shalt.err (!%p948_p2)
}
  0x1e   : > { %s965_s26 = smov 64   ;;  %s966_s27 = smov 4  }
  0x1f   : > { %868 = dma.hbm_to_vmem [thread:$0]  (!%p1008_p5), %s1063_s1, 5120, %s126_s15, [#allocation3], %s965_s26, %s965_s26, %s966_s27  }
  0x20   : > { %p1070_p6 = scmp.ne.s32.totalorder %s1068_s16, 0 }
  0x21   : > { %p1071_p8 = scmp.eq.s32.totalorder (!%p1070_p6), %s995_s13, 0 }
  0x22   : > { %151 = sbr.rel (%p1070_p6) target bundleno = 324 (0x144), region = 32 }
  0x29   : > { %957 = dma.done.wait (%p1071_p8), [#allocation3], 5120   ;;  %p1072_p7 = pmov %p1071_p8 }
  0x2a   : > { %v884_v0 = vld [vmem:[#allocation2 + $0x40] sm:$0xff]   ;;  %v888_v4 = vld [vmem:[#allocation2 + $0x48] sm:$0xff]   ;;  %v892_v8 = vld [vmem:[#allocation2 + $0x50] sm:$0xff]   ;;  %p173_p2 = scmp.lt.s32.totalorder %s995_s13, 1  ;;  %v967_v34 = vmov 0.0   ;;  %vm187_vm0 = vcmask 1041408  }
  0x2b   : > { %959 = vsyncadd (%p1072_p7), [#allocation3], 4294962176  ;;  %v885_v1 = vld [vmem:[#allocation2] sm:$0xff]   ;;  %788 = vmatprep.subr.bf16.mxu0 %v884_v0  ;;  %v889_v5 = vld [vmem:[#allocation2 + $0x8] sm:$0xff]   ;;  %vm192_vm1 = vcmask 1046528   ;;  %vm202_vm3 = vcmask 1044480  }
  0x2c   : > { %v886_v2 = vld [vmem:[#allocation2 + $0xc0] sm:$0xff]   ;;  %789 = vmatpush3.bf16.msra.mxu0 %v885_v1  ;;  %v890_v6 = vld [vmem:[#allocation2 + $0xc8] sm:$0xff]   ;;  %v893_v9 = vld [vmem:[#allocation2 + $0x10] sm:$0xff]   ;;  %s1076_s13 = smov (!%p173_p2, %s995_s13), 1  ;;  %vm197_vm4 = vcmask 1045504   ;;  %vm968_vm6 = vmmov 0  }
  0x2d   : > { %v887_v3 = vld [vmem:[#allocation2 + $0x80] sm:$0xff]   ;;  %810 = vmatprep.subr.bf16.mxu1 %v886_v2  ;;  %790 = vmatprep.subr.bf16.mxu0 %v888_v4  ;;  %v891_v7 = vld [vmem:[#allocation2 + $0x88] sm:$0xff]   ;;  %v894_v10 = vld [vmem:[#allocation2 + $0xd0] sm:$0xff]   ;;  %s738_s30 = sshll.u32 %s1076_s13, 2  ;;  %vm207_vm7 = vcmask 1043456  }
  0x2e   : > { %811 = vmatpush3.bf16.msra.mxu1 %v887_v3  ;;  %v895_v11 = vld [vmem:[#allocation2 + $0x90] sm:$0xff]   ;;  %v896_v12 = vld [vmem:[#allocation2 + $0x58] sm:$0xff]   ;;  %v900_v16 = vld [vmem:[#allocation2 + $0x60] sm:$0xff]   ;;  %s176_s6 = scalar_lea.vmem %s1062_s0, %s738_s30  ;;  %s180_s11 = scalar_lea.vmem %s1065_s3, %s738_s30 }
  0x2f   : > { %812 = vmatprep.subr.bf16.mxu1 %v890_v6  ;;  %v897_v13 = vld [vmem:[#allocation2 + $0x18] sm:$0xff]   ;;  %v901_v17 = vld [vmem:[#allocation2 + $0x20] sm:$0xff]   ;;  %v904_v20 = vld [vmem:[#allocation2 + $0x68] sm:$0xff]  }
  0x30   : > { %791 = vmatpush3.bf16.msra.mxu0 %v889_v5  ;;  %v898_v14 = vld [vmem:[#allocation2 + $0xd8] sm:$0xff]   ;;  %v902_v18 = vld [vmem:[#allocation2 + $0xe0] sm:$0xff]   ;;  %v905_v21 = vld [vmem:[#allocation2 + $0x28] sm:$0xff]  }
  0x31   : > { %792 = vmatprep.subr.bf16.mxu0 %v892_v8  ;;  %v899_v15 = vld [vmem:[#allocation2 + $0x98] sm:$0xff]   ;;  %v903_v19 = vld [vmem:[#allocation2 + $0xa0] sm:$0xff]   ;;  %v906_v22 = vld [vmem:[#allocation2 + $0xe8] sm:$0xff]  }
  0x32   : > { %813 = vmatpush3.bf16.msra.mxu1 %v891_v7  ;;  %v907_v23 = vld [vmem:[#allocation2 + $0xa8] sm:$0xff]   ;;  %v908_v24 = vld [vmem:[#allocation2 + $0x70] sm:$0xff]   ;;  %v912_v28 = vld [vmem:[#allocation2 + $0x78] sm:$0xff]  }
  0x33   : > { %814 = vmatprep.subr.bf16.mxu1 %v894_v10  ;;  %v909_v25 = vld [vmem:[#allocation2 + $0x30] sm:$0xff]   ;;  %v913_v29 = vld [vmem:[#allocation2 + $0x38] sm:$0xff]   ;;  %v182_v31 = vld [vmem:[%s176_s6] sm:$0xf] }
  0x34   : > { %793 = vmatpush3.bf16.msra.mxu0 %v893_v9  ;;  %v910_v26 = vld [vmem:[#allocation2 + $0xf0] sm:$0xff]   ;;  %v914_v30 = vld [vmem:[#allocation2 + $0xf8] sm:$0xff]   ;;  %v183_v32 = vunpack.c.l.bf16 %v182_v31  ;;  %vm1044_vm2 = vmneg %vm187_vm0 }
  0x35   : > { %794 = vmatprep.subr.bf16.mxu0 %v896_v12  ;;  %v911_v27 = vld [vmem:[#allocation2 + $0xb0] sm:$0xff]   ;;  %v915_v33 = vld [vmem:[#allocation2 + $0xb8] sm:$0xff]   ;;  %vm783_vm5 = vmpackc.low %vm1044_vm2, %vm1044_vm2 }
  0x36   : > { %815 = vmatpush3.bf16.msra.mxu1 %v895_v11  ;;  %v185_v35 = vrot.slane %v183_v32, 6  ;;  %v916_v50 = vld [vmem:[#allocation2 + $0x100] sm:$0xff]   ;;  %v917_v53 = vld [vmem:[#allocation2 + $0x108] sm:$0xff]   ;;  %v918_v54 = vld [vmem:[#allocation2 + $0x110] sm:$0xff]  }
  0x37   : > { %816 = vmatprep.subr.bf16.mxu1 %v898_v14  ;;  %v919_v55 = vld [vmem:[#allocation2 + $0x118] sm:$0xff]   ;;  %v920_v56 = vld [vmem:[#allocation2 + $0x120] sm:$0xff]   ;;  %v921_v57 = vld [vmem:[#allocation2 + $0x128] sm:$0xff]  }
  0x38   : > { %795 = vmatpush3.bf16.msra.mxu0 %v897_v13  ;;  %v188_v36 = vsel %vm187_vm0, 0.0, %v185_v35  ;;  %v189_v37 = vsel %vm187_vm0, %v185_v35, 0.0  ;;  %v784_v46 = vpack.c.bf16 %v185_v35, %v185_v35  ;;  %v922_v58 = vld [vmem:[#allocation2 + $0x130] sm:$0xff]   ;;  %v923_v61 = vld [vmem:[#allocation2 + $0x138] sm:$0xff]   ;;  %v740_v2 = vld [vmem:[%s1064_s2] ss:$0 sm:$0xff] }
  0x39   : > { %796 = vmatprep.subr.bf16.mxu0 %v900_v16  ;;  %v193_v39 = vrot.slane %v188_v36, 1  ;;  %v194_v40 = vrot.slane %v189_v37, 1  ;;  %v203_v41 = vrot.slane %v188_v36, 3  ;;  %v204_v42 = vrot.slane %v189_v37, 3 }
  0x3a   : > { %817 = vmatpush3.bf16.msra.mxu1 %v899_v15  ;;  %v198_v43 = vrot.slane %v188_v36, 2  ;;  %v199_v44 = vrot.slane %v189_v37, 2  ;;  %v208_v59 = vrot.slane %v188_v36, 4  ;;  %v209_v60 = vrot.slane %v189_v37, 4 }
  0x3b   : > { %818 = vmatprep.subr.bf16.mxu1 %v902_v18  ;;  %v195_v45 = vsel %vm192_vm1, %v193_v39, %v194_v40  ;;  %v205_v47 = vsel %vm202_vm3, %v203_v41, %v204_v42 }
  0x3c   : > { %797 = vmatpush3.bf16.msra.mxu0 %v901_v17  ;;  %v213_v48 = vpack.c.bf16 %v195_v45, %v195_v45  ;;  %v215_v49 = vpack.c.bf16 %v205_v47, %v205_v47  ;;  %v200_v51 = vsel %vm197_vm4, %v198_v43, %v199_v44  ;;  %v210_v62 = vsel %vm207_vm7, %v208_v59, %v209_v60 }
  0x3d   : > { %798 = vmatprep.subr.bf16.mxu0 %v904_v20  ;;  %v214_v52 = vpack.c.bf16 %v200_v51, %v200_v51  ;;  %v216_v63 = vpack.c.bf16 %v210_v62, %v210_v62 }
  0x3e   : > { %819 = vmatpush3.bf16.msra.mxu1 %v903_v19  ;;  %576 = vmatprep.mubr.bf16.mxu0 %v213_v48 }
  0x3f   : > { %820 = vmatprep.subr.bf16.mxu1 %v906_v22  ;;  %616 = vmatprep.mubr.bf16.mxu1 %v215_v49 }
  0x40   : > { %799 = vmatpush3.bf16.msra.mxu0 %v905_v21 }
  0x41   : > { %800 = vmatprep.subr.bf16.mxu0 %v908_v24 }
  0x42   : > { %821 = vmatpush3.bf16.msra.mxu1 %v907_v23 }
  0x43   : > { %822 = vmatprep.subr.bf16.mxu1 %v910_v26 }
  0x44   : > { %801 = vmatpush3.bf16.msra.mxu0 %v909_v25 }
  0x45   : > { %802 = vmatprep.subr.bf16.mxu0 %v912_v28 }
  0x46   : > { %823 = vmatpush3.bf16.msra.mxu1 %v911_v27 }
  0x47   : > { %824 = vmatprep.subr.bf16.mxu1 %v914_v30 }
  0x48   : > { %803 = vmatpush3.bf16.msra.mxu0 %v913_v29 }
  0x49   : > { %841 = vmatprep.subr.bf16.mxu0 %v967_v34 }
  0x4a   : > { %825 = vmatpush3.bf16.msra.mxu1 %v915_v33 }
  0x4b   : > { %785 = vmatmul.mubr.msk.bf16.vlgmr.msra.gmra.mrb[0].mxu0 %vm783_vm5, %v784_v46 }
  0x4c   : > { %842 = vmatpush3.bf16.msra.mxu0 %v916_v50  ;;  %857 = vmatprep.mubr.msk.bf16.mxu0 %vm968_vm6, %v967_v34 }
  0x4d   : > { %617 = vmatmul.mubr.bf16.vlgmr.msra.gmra.mrb[0].mxu1 %v214_v52  ;;  %843 = vmatprep.subr.bf16.mxu0 %v967_v34 }
  0x50   : > { %844 = vmatpush3.bf16.msra.mxu0 %v917_v53 }
  0x51   : > { %845 = vmatprep.subr.bf16.mxu0 %v967_v34 }
  0x54   : > { %846 = vmatpush3.bf16.msra.mxu0 %v918_v54 }
  0x55   : > { %847 = vmatprep.subr.bf16.mxu0 %v967_v34 }
  0x58   : > { %848 = vmatpush3.bf16.msra.mxu0 %v919_v55 }
  0x59   : > { %849 = vmatprep.subr.bf16.mxu0 %v967_v34 }
  0x5c   : > { %850 = vmatpush3.bf16.msra.mxu0 %v920_v56 }
  0x5d   : > { %851 = vmatprep.subr.bf16.mxu0 %v967_v34 }
  0x60   : > { %852 = vmatpush3.bf16.msra.mxu0 %v921_v57 }
  0x61   : > { %853 = vmatprep.subr.bf16.mxu0 %v967_v34 }
  0x64   : > { %854 = vmatpush3.bf16.msra.mxu0 %v922_v58 }
  0x65   : > { %855 = vmatprep.subr.bf16.mxu0 %v967_v34 }
  0x68   : > { %856 = vmatpush3.bf16.msra.mxu0 %v923_v61 }
  0x6b   : > { %858 = vmatmul.mubr.bf16.vlgmr.msra.gmra.mrb[4].mxu0 %v216_v63 }
 0x11e   : > { %v804_v0 = vpop.f32.mrb[0].mxu0 }
 0x11f   : > { %v805_v3 = vpop.f32.mrb[1].mxu0 }
 0x120   : > { %v826_v1 = vpop.f32.mrb[0].mxu1  ;;  %v806_v5 = vadd.f32 %v805_v3, %v804_v0  ;;  %v807_v6 = vpop.f32.mrb[2].mxu0 }
 0x121   : > { %v827_v4 = vpop.f32.mrb[1].mxu1  ;;  %v808_v9 = vpop.f32.mrb[3].mxu0 }
 0x122   : > { %v828_v7 = vadd.f32 %v827_v4, %v826_v1  ;;  %v829_v8 = vpop.f32.mrb[2].mxu1  ;;  %v579_v11 = vadd.f32 %v806_v5, %v740_v2 }
 0x123   : > { %v830_v10 = vpop.f32.mrb[3].mxu1 }
 0x124   : > { %v619_v12 = vadd.f32 %v828_v7, %v579_v11 }
 0x13e   : > { %v658_v13 = vpop.f32.mrb[4].mxu0 }
 0x13f   : > { %v659_v14 = vadd.f32 %v658_v13, %v619_v12  ;;  %v859_v15 = vpop.f32.mrb[5].mxu0 }
 0x140   : > { %v661_v16 = vpop.f32.mrb[6].mxu0 }
 0x141   : > { %v664_v17 = vpack.c.bf16 %v659_v14, %v659_v14  ;;  %v860_v18 = vpop.f32.mrb[7].mxu0 }
 0x143   : > { %665 = vst [vmem:[%s180_s11] sm:$0xf] %v664_v17 }
 0x144 PF: > { %s14_s12 = sadd.s32 1, %s962_s12  }
 0x145   : > { %p11_p3 = scmp.ge.s32.totalorder %s14_s12, 4  }
 0x147   :  { %13 = sbr.rel (!%p11_p3) target bundleno = 1 (0x1), region = 67 }
 0x14e   :  { %685 = vsyncpa [#allocation3], 1 }
 0x14f   :  { %687 = vsyncpa [#allocation3 + $0x1], 1 }

// kernel: bytenet_lm_time_forward.15
= control target key start
LH: loop header
LB: loop body
LE: loop exit
PB: predicated region body
PF: predicated region fallthrough
CT: control target
= control target key end

     0   :  { %v248_v1 = vmov 0.0   ;;  %vm249_vm0 = vmmov 0   ;;  %s315_s0 = inlined_call_operand.vmem [shape: bf16[16,128], index: 0, kind: input, shape index: {}]   ;;  %s316_s1 = inlined_call_operand.vmem [shape: bf16[128,128], index: 1, kind: input, shape index: {}]   ;;  %s317_s2 = inlined_call_operand.vmem [shape: f32[1,128], index: 2, kind: input, shape index: {}]   ;;  %s318_s3 = inlined_call_operand.hbm [shape: bf16[16,128], index: 3, kind: output, shape index: {}]  }
   0x1   :  { %v215_v0 = vld [vmem:[%s316_s1] sm:$0xff]   ;;  %190 = vmatprep.subr.bf16.mxu0 %v248_v1  ;;  %v216_v2 = vld [vmem:[%s316_s1 + $0x8] sm:$0xff]   ;;  %206 = vmatprep.mubr.msk.bf16.mxu0 %vm249_vm0, %v248_v1  ;;  %v217_v3 = vld [vmem:[%s316_s1 + $0x10] sm:$0xff]  }
   0x2   :  { %191 = vmatpush3.bf16.msra.mxu0 %v215_v0 }
   0x3   :  { %192 = vmatprep.subr.bf16.mxu0 %v248_v1 }
   0x6   :  { %193 = vmatpush3.bf16.msra.mxu0 %v216_v2 }
   0x7   :  { %194 = vmatprep.subr.bf16.mxu0 %v248_v1 }
   0x8   :  { %8 = vsyncpa [#allocation3], 0  ;;  %v218_v4 = vld [vmem:[%s316_s1 + $0x18] sm:$0xff]   ;;  %v219_v5 = vld [vmem:[%s316_s1 + $0x20] sm:$0xff]   ;;  %s250_s5 = smov [#allocation2]  }
   0x9   :  { %v220_v6 = vld [vmem:[%s316_s1 + $0x28] sm:$0xff]   ;;  %v221_v7 = vld [vmem:[%s316_s1 + $0x30] sm:$0xff]   ;;  %v222_v8 = vld [vmem:[%s316_s1 + $0x38] sm:$0xff]   ;;  %s151_s6 = sshll.u32 %s250_s5, 4  ;;  %s152_s6 = int_to_ptr.vmem [resolvable:$true] %s151_s6 }
   0xa   :  { %195 = vmatpush3.bf16.msra.mxu0 %v217_v3  ;;  %v223_v9 = vld [vmem:[%s315_s0] sm:$0xff]   ;;  %s224_s1 = scalar_lea.vmem %s152_s6, 128  ;;  %p229_p1 = scmp.lt.s32.totalorder %s152_s6, %s152_s6 }
   0xb   :  { %196 = vmatprep.subr.bf16.mxu0 %v248_v1  ;;  %v162_v10 = vld [vmem:[%s317_s2] ss:$0 sm:$0xff]  ;;  %p225_p0 = scmp.ne.s32.totalorder %s152_s6, %s224_s1  ;;  %p230_p2 = scmp.lt.s32.totalorder %s224_s1, %s224_s1 }
   0xd   :  { %p231_p3 = por %p230_p2, %p229_p1 }
   0xe   :  { %197 = vmatpush3.bf16.msra.mxu0 %v218_v4 }
   0xf   :  { %198 = vmatprep.subr.bf16.mxu0 %v248_v1  ;;  %p232_p4 = pnand %p231_p3, %p225_p0 }
  0x12   :  { %199 = vmatpush3.bf16.msra.mxu0 %v219_v5 }
  0x13   :  { %200 = vmatprep.subr.bf16.mxu0 %v248_v1 }
  0x16   :  { %201 = vmatpush3.bf16.msra.mxu0 %v220_v6 }
  0x17   :  { %202 = vmatprep.subr.bf16.mxu0 %v248_v1 }
  0x1a   :  { %203 = vmatpush3.bf16.msra.mxu0 %v221_v7 }
  0x1b   :  { %204 = vmatprep.subr.bf16.mxu0 %v248_v1 }
  0x1e   :  { %205 = vmatpush3.bf16.msra.mxu0 %v222_v8 }
  0x21   :  { %207 = vmatmul.mubr.bf16.vlgmr.msra.gmra.mrb[0].mxu0 %v223_v9 }
  0xf4   :  { %v129_v11 = vpop.f32.mrb[0].mxu0 }
  0xf5   :  { %v208_v12 = vpop.f32.mrb[1].mxu0  ;;  %v130_v14 = vadd.f32 %v162_v10, %v129_v11 }
  0xf6   :  { %v132_v13 = vpop.f32.mrb[2].mxu0 }
  0xf7   :  { %v133_v15 = vadd.f32 %v162_v10, %v132_v13  ;;  %v209_v16 = vpop.f32.mrb[3].mxu0 }
  0xf9   :  { %v179_v17 = vpack.c.bf16 %v133_v15, %v130_v14 }
  0xfb   :  { %180 = vst [vmem:[#allocation2] sm:$0xff] %v179_v17  }
  0xfc   :  { %235 = shalt.err (!%p232_p4)
}
  0xfd   :  { %s236_s7 = scalar_lea.hbm %s318_s3, 128 }
  0xfe   :  { %p237_p5 = scmp.ne.s32.totalorder %s318_s3, %s236_s7  ;;  %p240_p6 = scmp.lt.u32.totalorder %s236_s7, %s318_s3 }
 0x100   :  { %p242_p7 = pnand %p240_p6, %p237_p5 }
 0x102   :  { %245 = shalt.err (!%p242_p7)
}
 0x103   :  { %s251_s12 = smov 64   ;;  %s252_s13 = smov 4  }
 0x104   :  { %157 = dma.vmem_to_hbm [thread:$0]  %s152_s6, 128, %s318_s3, [#allocation3], %s251_s12, %s251_s12, %s252_s13  }
 0x105   :  { %246 = dma.done.wait [#allocation3], 128  }
 0x106   :  { %247 = vsyncadd [#allocation3], 4294967168 }
 0x107   :  { %161 = vsyncpa [#allocation3], 1 }

// kernel: bytenet_lm_time_forward.13
= control target key start
LH: loop header
LB: loop body
LE: loop exit
PB: predicated region body
PF: predicated region fallthrough
CT: control target
= control target key end

     0   :  { %s909_s12 = smov 0   ;;  %s1073_s0 = inlined_call_operand.vmem [shape: bf16[2,8,128], index: 0, kind: input, shape index: {}]   ;;  %s1074_s1 = inlined_call_operand.vmem [shape: bf16[640,128], index: 1, kind: input, shape index: {}]   ;;  %s1075_s2 = inlined_call_operand.vmem [shape: f32[1,128], index: 2, kind: input, shape index: {}]   ;;  %s1076_s3 = inlined_call_operand.vmem [shape: bf16[2,8,128], index: 3, kind: output, shape index: {}]  }
   0x1 LB: > { %s698_s13 = sadd.s32 4294967295, %s885_s12   ;;  %p702_p0 = scmp.ge.s32.totalorder %s885_s12, 1  ;;  %s885_s12 = sphi %s909_s12, %s13_s12  }
   0x2   : > { %p136_p1 = scmp.lt.s32.totalorder %s885_s12, 3 }
   0x4   : > { %p137_p2 = pnand %p702_p0, %p136_p1 }
   0x5   : > { %v839_v0 = vld [vmem:[%s1074_s1 + $0x40] sm:$0xff] (!%p137_p2)   ;;  %v843_v4 = vld [vmem:[%s1074_s1 + $0x48] sm:$0xff] (!%p137_p2)   ;;  %v847_v8 = vld [vmem:[%s1074_s1 + $0x50] sm:$0xff] (!%p137_p2)   ;;  %p158_p3 = scmp.lt.s32.totalorder (!%p137_p2), %s698_s13, 1  ;;  %v887_v34 = vmov (!%p137_p2), 0.0   ;;  %vm172_vm0 = vcmask (!%p137_p2), 1043456  }
   0x6   : > { %140 = sbr.rel (%p137_p2) target bundleno = 287 (0x11f), region = 32  ;;  %v840_v1 = vld [vmem:[%s1074_s1] sm:$0xff] (!%p137_p2)   ;;  %756 = vmatprep.subr.bf16.mxu0 (!%p137_p2), %v839_v0  ;;  %v844_v5 = vld [vmem:[%s1074_s1 + $0x8] sm:$0xff] (!%p137_p2)   ;;  %v848_v9 = vld [vmem:[%s1074_s1 + $0x10] sm:$0xff] (!%p137_p2)   ;;  %vm177_vm1 = vcmask (!%p137_p2), 1045504   ;;  %vm186_vm2 = vcmask (!%p137_p2), 1041408  }
   0x7   : > { %v841_v2 = vld [vmem:[%s1074_s1 + $0xc0] sm:$0xff] (!%p137_p2)   ;;  %757 = vmatpush3.bf16.msra.mxu0 (!%p137_p2), %v840_v1  ;;  %v845_v6 = vld [vmem:[%s1074_s1 + $0xc8] sm:$0xff] (!%p137_p2)   ;;  %v849_v10 = vld [vmem:[%s1074_s1 + $0xd0] sm:$0xff] (!%p137_p2)   ;;  %vm888_vm5 = vmmov (!%p137_p2), 0  }
   0x8   : > { %v842_v3 = vld [vmem:[%s1074_s1 + $0x80] sm:$0xff] (!%p137_p2)   ;;  %778 = vmatprep.subr.bf16.mxu1 (!%p137_p2), %v841_v2  ;;  %758 = vmatprep.subr.bf16.mxu0 (!%p137_p2), %v843_v4  ;;  %v846_v7 = vld [vmem:[%s1074_s1 + $0x88] sm:$0xff] (!%p137_p2)   ;;  %v850_v11 = vld [vmem:[%s1074_s1 + $0x90] sm:$0xff] (!%p137_p2)  }
   0x9   : > { %779 = vmatpush3.bf16.msra.mxu1 (!%p137_p2), %v842_v3  ;;  %v851_v12 = vld [vmem:[%s1074_s1 + $0x58] sm:$0xff] (!%p137_p2)   ;;  %v855_v16 = vld [vmem:[%s1074_s1 + $0x60] sm:$0xff] (!%p137_p2)   ;;  %v859_v20 = vld [vmem:[%s1074_s1 + $0x68] sm:$0xff] (!%p137_p2)  }
   0xa   : > { %780 = vmatprep.subr.bf16.mxu1 (!%p137_p2), %v845_v6  ;;  %v852_v13 = vld [vmem:[%s1074_s1 + $0x18] sm:$0xff] (!%p137_p2)   ;;  %v856_v17 = vld [vmem:[%s1074_s1 + $0x20] sm:$0xff] (!%p137_p2)   ;;  %v860_v21 = vld [vmem:[%s1074_s1 + $0x28] sm:$0xff] (!%p137_p2)  }
   0xb   : > { %759 = vmatpush3.bf16.msra.mxu0 (!%p137_p2), %v844_v5  ;;  %v853_v14 = vld [vmem:[%s1074_s1 + $0xd8] sm:$0xff] (!%p137_p2)   ;;  %v857_v18 = vld [vmem:[%s1074_s1 + $0xe0] sm:$0xff] (!%p137_p2)   ;;  %v861_v22 = vld [vmem:[%s1074_s1 + $0xe8] sm:$0xff] (!%p137_p2)  }
   0xc   : > { %760 = vmatprep.subr.bf16.mxu0 (!%p137_p2), %v847_v8  ;;  %v854_v15 = vld [vmem:[%s1074_s1 + $0x98] sm:$0xff] (!%p137_p2)   ;;  %v858_v19 = vld [vmem:[%s1074_s1 + $0xa0] sm:$0xff] (!%p137_p2)   ;;  %v862_v23 = vld [vmem:[%s1074_s1 + $0xa8] sm:$0xff] (!%p137_p2)  }
   0xd   : > { %781 = vmatpush3.bf16.msra.mxu1 %v846_v7  ;;  %s1080_s13 = smov (!%p158_p3, %s698_s13), 1  ;;  %v863_v24 = vld [vmem:[%s1074_s1 + $0x70] sm:$0xff]   ;;  %v867_v28 = vld [vmem:[%s1074_s1 + $0x78] sm:$0xff]   ;;  %vm1028_vm3 = vmneg %vm172_vm0 }
   0xe   : > { %782 = vmatprep.subr.bf16.mxu1 %v849_v10  ;;  %v864_v25 = vld [vmem:[%s1074_s1 + $0x30] sm:$0xff]   ;;  %s703_s16 = sshll.u32 %s1080_s13, 2  ;;  %v868_v29 = vld [vmem:[%s1074_s1 + $0x38] sm:$0xff]   ;;  %vm748_vm4 = vmpackc.low %vm1028_vm3, %vm1028_vm3 }
   0xf   : > { %761 = vmatpush3.bf16.msra.mxu0 %v848_v9  ;;  %v865_v26 = vld [vmem:[%s1074_s1 + $0xf0] sm:$0xff]   ;;  %s161_s25 = scalar_lea.vmem %s1073_s0, %s703_s16  ;;  %v869_v30 = vld [vmem:[%s1074_s1 + $0xf8] sm:$0xff]   ;;  %v871_v50 = vld [vmem:[%s1074_s1 + $0x100] sm:$0xff]   ;;  %s165_s28 = scalar_lea.vmem %s1076_s3, %s703_s16 }
  0x10   : > { %762 = vmatprep.subr.bf16.mxu0 %v851_v12  ;;  %v866_v27 = vld [vmem:[%s1074_s1 + $0xb0] sm:$0xff]   ;;  %v167_v31 = vld [vmem:[%s161_s25] sm:$0xf]  ;;  %v870_v33 = vld [vmem:[%s1074_s1 + $0xb8] sm:$0xff]  }
  0x11   : > { %783 = vmatpush3.bf16.msra.mxu1 %v850_v11  ;;  %v168_v32 = vunpack.c.l.bf16 %v167_v31  ;;  %v872_v53 = vld [vmem:[%s1074_s1 + $0x108] sm:$0xff]   ;;  %v873_v54 = vld [vmem:[%s1074_s1 + $0x110] sm:$0xff]   ;;  %v874_v55 = vld [vmem:[%s1074_s1 + $0x118] sm:$0xff]  }
  0x12   : > { %784 = vmatprep.subr.bf16.mxu1 %v853_v14  ;;  %v875_v56 = vld [vmem:[%s1074_s1 + $0x120] sm:$0xff]   ;;  %v876_v57 = vld [vmem:[%s1074_s1 + $0x128] sm:$0xff]   ;;  %v877_v58 = vld [vmem:[%s1074_s1 + $0x130] sm:$0xff]  }
  0x13   : > { %763 = vmatpush3.bf16.msra.mxu0 %v852_v13  ;;  %v170_v35 = vrot.slane %v168_v32, 4  ;;  %v878_v59 = vld [vmem:[%s1074_s1 + $0x138] sm:$0xff]   ;;  %vm751_vm6 = vmpackc.low %vm172_vm0, %vm172_vm0  ;;  %v705_v62 = vld [vmem:[%s1075_s2] ss:$0 sm:$0xff] }
  0x14   : > { %764 = vmatprep.subr.bf16.mxu0 %v855_v16 }
  0x15   : > { %785 = vmatpush3.bf16.msra.mxu1 %v854_v15  ;;  %v173_v36 = vsel %vm172_vm0, 0.0, %v170_v35  ;;  %v174_v37 = vsel %vm172_vm0, %v170_v35, 0.0  ;;  %v749_v46 = vpack.c.bf16 %v170_v35, %v170_v35 }
  0x16   : > { %786 = vmatprep.subr.bf16.mxu1 %v857_v18  ;;  %v178_v39 = vrot.slane %v173_v36, 2  ;;  %v179_v40 = vrot.slane %v174_v37, 2  ;;  %v187_v41 = vrot.slane %v173_v36, 6  ;;  %v188_v42 = vrot.slane %v174_v37, 6 }
  0x17   : > { %765 = vmatpush3.bf16.msra.mxu0 %v856_v17  ;;  %v182_v43 = vrot.slane %v173_v36, 4  ;;  %v183_v44 = vrot.slane %v174_v37, 4 }
  0x18   : > { %766 = vmatprep.subr.bf16.mxu0 %v859_v20  ;;  %v180_v45 = vsel %vm177_vm1, %v178_v39, %v179_v40  ;;  %v189_v47 = vsel %vm186_vm2, %v187_v41, %v188_v42 }
  0x19   : > { %787 = vmatpush3.bf16.msra.mxu1 %v858_v19  ;;  %v192_v48 = vpack.c.bf16 %v180_v45, %v180_v45  ;;  %v194_v49 = vpack.c.bf16 %v189_v47, %v189_v47  ;;  %v184_v51 = vsel %vm172_vm0, %v182_v43, %v183_v44 }
  0x1a   : > { %788 = vmatprep.subr.bf16.mxu1 %v861_v22  ;;  %v193_v52 = vpack.c.bf16 %v184_v51, %v184_v51 }
  0x1b   : > { %767 = vmatpush3.bf16.msra.mxu0 %v860_v21  ;;  %555 = vmatprep.mubr.bf16.mxu0 %v192_v48 }
  0x1c   : > { %768 = vmatprep.subr.bf16.mxu0 %v863_v24  ;;  %595 = vmatprep.mubr.bf16.mxu1 %v194_v49 }
  0x1d   : > { %789 = vmatpush3.bf16.msra.mxu1 %v862_v23 }
  0x1e   : > { %790 = vmatprep.subr.bf16.mxu1 %v865_v26 }
  0x1f   : > { %769 = vmatpush3.bf16.msra.mxu0 %v864_v25 }
  0x20   : > { %770 = vmatprep.subr.bf16.mxu0 %v867_v28 }
  0x21   : > { %791 = vmatpush3.bf16.msra.mxu1 %v866_v27 }
  0x22   : > { %792 = vmatprep.subr.bf16.mxu1 %v869_v30 }
  0x23   : > { %771 = vmatpush3.bf16.msra.mxu0 %v868_v29 }
  0x24   : > { %809 = vmatprep.subr.bf16.mxu0 %v887_v34 }
  0x25   : > { %793 = vmatpush3.bf16.msra.mxu1 %v870_v33 }
  0x26   : > { %750 = vmatmul.mubr.msk.bf16.vlgmr.msra.gmra.mrb[0].mxu0 %vm748_vm4, %v749_v46 }
  0x27   : > { %810 = vmatpush3.bf16.msra.mxu0 %v871_v50  ;;  %825 = vmatprep.mubr.msk.bf16.mxu0 %vm888_vm5, %v887_v34 }
  0x28   : > { %596 = vmatmul.mubr.bf16.vlgmr.msra.gmra.mrb[0].mxu1 %v193_v52  ;;  %811 = vmatprep.subr.bf16.mxu0 %v887_v34 }
  0x2b   : > { %812 = vmatpush3.bf16.msra.mxu0 %v872_v53 }
  0x2c   : > { %813 = vmatprep.subr.bf16.mxu0 %v887_v34 }
  0x2f   : > { %814 = vmatpush3.bf16.msra.mxu0 %v873_v54 }
  0x30   : > { %815 = vmatprep.subr.bf16.mxu0 %v887_v34 }
  0x33   : > { %816 = vmatpush3.bf16.msra.mxu0 %v874_v55 }
  0x34   : > { %817 = vmatprep.subr.bf16.mxu0 %v887_v34 }
  0x37   : > { %818 = vmatpush3.bf16.msra.mxu0 %v875_v56 }
  0x38   : > { %819 = vmatprep.subr.bf16.mxu0 %v887_v34 }
  0x3b   : > { %820 = vmatpush3.bf16.msra.mxu0 %v876_v57 }
  0x3c   : > { %821 = vmatprep.subr.bf16.mxu0 %v887_v34 }
  0x3f   : > { %822 = vmatpush3.bf16.msra.mxu0 %v877_v58 }
  0x40   : > { %823 = vmatprep.subr.bf16.mxu0 %v887_v34 }
  0x43   : > { %824 = vmatpush3.bf16.msra.mxu0 %v878_v59 }
  0x46   : > { %826 = vmatmul.mubr.msk.bf16.vlgmr.msra.gmra.mrb[4].mxu0 %vm751_vm6, %v749_v46 }
  0xf9   : > { %v772_v60 = vpop.f32.mrb[0].mxu0 }
  0xfa   : > { %v773_v63 = vpop.f32.mrb[1].mxu0 }
  0xfb   : > { %v794_v61 = vpop.f32.mrb[0].mxu1  ;;  %v774_v1 = vadd.f32 %v773_v63, %v772_v60  ;;  %v775_v2 = vpop.f32.mrb[2].mxu0 }
  0xfc   : > { %v795_v0 = vpop.f32.mrb[1].mxu1  ;;  %v776_v5 = vpop.f32.mrb[3].mxu0 }
  0xfd   : > { %v796_v3 = vadd.f32 %v795_v0, %v794_v61  ;;  %v797_v4 = vpop.f32.mrb[2].mxu1  ;;  %v558_v7 = vadd.f32 %v774_v1, %v705_v62 }
  0xfe   : > { %v798_v6 = vpop.f32.mrb[3].mxu1 }
  0xff   : > { %v598_v8 = vadd.f32 %v796_v3, %v558_v7 }
 0x119   : > { %v637_v9 = vpop.f32.mrb[4].mxu0 }
 0x11a   : > { %v638_v10 = vadd.f32 %v637_v9, %v598_v8  ;;  %v827_v11 = vpop.f32.mrb[5].mxu0 }
 0x11b   : > { %v640_v12 = vpop.f32.mrb[6].mxu0 }
 0x11c   : > { %v643_v13 = vpack.c.bf16 %v638_v10, %v638_v10  ;;  %v828_v14 = vpop.f32.mrb[7].mxu0 }
 0x11e   : > { %644 = vst [vmem:[%s165_s28] sm:$0xf] %v643_v13 }
 0x11f PF: > { %s13_s12 = sadd.s32 1, %s885_s12  }
 0x120   : > { %p10_p4 = scmp.ge.s32.totalorder %s13_s12, 4  }
 0x122   :  { %12 = sbr.rel (!%p10_p4) target bundleno = 1 (0x1), region = 62 }

</bundles_post_ra>
